<compile_context>
chip_gen: v7x
topology: tpu7x:2x2x1
jax: 0.10.0
libtpu: 0.0.40
codegen_flags: <defaults>
</compile_context>

<pallas_src>
import functools

import jax
import jax.numpy as jnp
from jax.experimental import pallas as pl
from jax.experimental.pallas import tpu as pltpu


def _se_kernel(x_ref, w1_ref, b1_ref, w2_ref, b2_ref, o_ref, *, inv_hw):
    # x_ref: (BT, C, HW)  w1: (MID, C)  b1: (1, MID)  w2: (C, MID)  b2: (1, C)
    x = x_ref[...]                                            # (BT, C, HW)
    xf = x.astype(jnp.float32)

    # Squeeze: global average pool over the spatial (lane) axis.
    # 1/HW folded into a constant multiply (plain VPU fmul, no divide).
    pooled = jnp.sum(xf, axis=-1) * inv_hw                    # (BT, C) f32

    # Excite conv1 (1x1): tiny (MID x C) contraction -> VPU broadcast-mul +
    # lane reduce; keeps the MXU and its result-FIFO off the critical path.
    w1 = w1_ref[...].astype(jnp.float32)                      # (MID, C)
    b1 = b1_ref[...].astype(jnp.float32)                      # (1, MID)
    h = jnp.sum(pooled[:, None, :] * w1, axis=-1) + b1        # (BT, MID)
    h = jnp.maximum(h, 0.0)                                   # ReLU

    # Excite conv2 (1x1): (C x MID) contraction, again on the VPU.
    w2 = w2_ref[...].astype(jnp.float32)                      # (C, MID)
    b2 = b2_ref[...].astype(jnp.float32)                      # (1, C)
    t = jnp.sum(h[:, None, :] * w2, axis=-1) + b2             # (BT, C)

    # HSigmoid: relu6(t + 3) / 6 == clip(t * (1/6) + 0.5, 0, 1).
    scale = jnp.clip(t * (1.0 / 6.0) + 0.5, 0.0, 1.0)         # (BT, C)

    # Scale: single fused broadcast-multiply + one store (no scratch round-trip;
    # v5e has only one vst slot per bundle).
    o_ref[...] = (xf * scale[:, :, None]).astype(o_ref.dtype)


def _pick_block_batch(B, per_image_bytes):
    """Images per grid step.

    Big enough to amortize the ~0.35 us per-step overhead (target ~4 MiB block),
    small enough that double-buffered in+out blocks (4 x block) stay well under
    v7x's 64 MiB physical / 32 MiB default scoped VMEM, and — when possible —
    leaving >= 2 grid steps so both v7x TensorCores get work.
    """
    target_bytes = 4 << 20
    cap_bytes = 8 << 20                         # 4 * cap = 32 MiB double-buffered
    bt = max(1, min(target_bytes, cap_bytes) // per_image_bytes)
    bt = int(min(bt, B))
    if bt >= B and B >= 2:                      # keep >= 2 grid steps (v7x dual-TC)
        bt = max(1, B // 2)
    while B % bt:                               # BT must divide B evenly
        bt -= 1
    return bt


def se_layer(x, w1, b1, w2, b2, *, block_batch=None):
    """x: (B, C, H, W); w1: (MID, C); b1: (MID,); w2: (C, MID); b2: (C,)."""
    B, C, H, W = x.shape
    MID = w1.shape[0]
    HW = H * W

    # NOTE: this one-pass design keeps the full (C, HW) plane of each image in
    # VMEM (pooling is coupled to the block).  For very large feature maps
    # (C*HW per image approaching VMEM), split into a pooled/scale pass plus a
    # tiled elementwise-multiply pass with HW tiled in multiples of 128.

    per_image_bytes = C * HW * x.dtype.itemsize
    if block_batch is None:
        block_batch = _pick_block_batch(B, per_image_bytes)
    BT = int(block_batch)
    assert B % BT == 0, "block_batch must divide the batch size"

    block_bytes = BT * per_image_bytes
    # Double-buffered input + output blocks dominate the VMEM footprint; give
    # explicit headroom but stay under v7x's 64 MiB physical VMEM.
    vmem_limit = int(min(max(4 * block_bytes + (4 << 20), 16 << 20), 48 << 20))

    x_flat = x.reshape(B, C, HW)
    b1_row = b1.reshape(1, MID)
    b2_row = b2.reshape(1, C)

    kernel = functools.partial(_se_kernel, inv_hw=1.0 / HW)

    out_flat = pl.pallas_call(
        kernel,
        out_shape=jax.ShapeDtypeStruct((B, C, HW), x.dtype),
        grid_spec=pltpu.PrefetchScalarGridSpec(
            num_scalar_prefetch=0,
            grid=(B // BT,),
            in_specs=[
                pl.BlockSpec((BT, C, HW), lambda b: (b, 0, 0)),   # x (batched block)
                pl.BlockSpec((MID, C), lambda b: (0, 0)),         # conv1 weight (resident)
                pl.BlockSpec((1, MID), lambda b: (0, 0)),         # conv1 bias
                pl.BlockSpec((C, MID), lambda b: (0, 0)),         # conv2 weight
                pl.BlockSpec((1, C), lambda b: (0, 0)),           # conv2 bias
            ],
            out_specs=pl.BlockSpec((BT, C, HW), lambda b: (b, 0, 0)),
        ),
        compiler_params=pltpu.CompilerParams(
            dimension_semantics=("parallel",),
            vmem_limit_bytes=vmem_limit,
        ),
    )(x_flat, w1, b1_row, w2, b2_row)

    return out_flat.reshape(B, C, H, W)


def _reference(x, w1, b1, w2, b2):
    # Pure-JAX reference of the SELayer forward pass.
    pooled = jnp.mean(x.astype(jnp.float32), axis=(2, 3), keepdims=True)   # (B,C,1,1)
    h = jnp.einsum("mc,bcxy->bmxy", w1, pooled) + b1[None, :, None, None]
    h = jnp.maximum(h, 0.0)
    t = jnp.einsum("cm,bmxy->bcxy", w2, h) + b2[None, :, None, None]
    scale = jnp.clip((t + 3.0) / 6.0, 0.0, 1.0)
    return (x.astype(jnp.float32) * scale).astype(x.dtype)


if __name__ == "__main__":
    # Module hyperparameters (defaults): reduction=16 -> mid = C // 16 + 1.
    B, C, H, W = 8, 32, 16, 16          # HW = 256 -> lane-dense (multiple of 128)
    REDUCTION = 16
    MID = C // REDUCTION + 1            # 3

    key = jax.random.PRNGKey(0)
    kx, k1, k2, k3, k4 = jax.random.split(key, 5)

    x = jax.random.normal(kx, (B, C, H, W), dtype=jnp.float32)
    # conv1: Conv2d(C -> MID, k=1) -> weight (MID, C, 1, 1) squeezed to (MID, C)
    w1 = jax.random.normal(k1, (MID, C), dtype=jnp.float32) * 0.1
    b1 = jax.random.normal(k2, (MID,), dtype=jnp.float32) * 0.1
    # conv2: Conv2d(MID -> C, k=1) -> weight (C, MID, 1, 1) squeezed to (C, MID)
    w2 = jax.random.normal(k3, (C, MID), dtype=jnp.float32) * 0.1
    b2 = jax.random.normal(k4, (C,), dtype=jnp.float32) * 0.1

    out = se_layer(x, w1, b1, w2, b2)
    jax.block_until_ready(out)

    ref = _reference(x, w1, b1, w2, b2)
    assert out.shape == (B, C, H, W)
    assert jnp.allclose(out, ref, atol=1e-5, rtol=1e-5), "mismatch vs reference"

    print("KERNEL_OK")
</pallas_src>

<mosaic_0001>
module attributes {stable_mosaic.version = 11 : i64} {
  func.func @_se_kernel(%arg0: i32, %arg1: memref<4x32x256xf32, #tpu.memory_space<vmem>>, %arg2: memref<3x32xf32, #tpu.memory_space<vmem>>, %arg3: memref<1x3xf32, #tpu.memory_space<vmem>>, %arg4: memref<32x3xf32, #tpu.memory_space<vmem>>, %arg5: memref<1x32xf32, #tpu.memory_space<vmem>>, %arg6: memref<4x32x256xf32, #tpu.memory_space<vmem>>) attributes {dimension_semantics = [#tpu.dimension_semantics<parallel>], iteration_bounds = array<i64: 2>, scalar_prefetch = 0 : i64, scratch_operands = 0 : i64, tpu.core_type = #tpu.core_type<tc>, window_params = [{transform_indices = @transform_0, window_bounds = array<i64: 4, 32, 256>}, {pipeline_mode = #tpu.pipeline_mode<synchronous>, transform_indices = @transform_1, window_bounds = array<i64: 3, 32>}, {pipeline_mode = #tpu.pipeline_mode<synchronous>, transform_indices = @transform_2, window_bounds = array<i64: 1, 3>}, {pipeline_mode = #tpu.pipeline_mode<synchronous>, transform_indices = @transform_3, window_bounds = array<i64: 32, 3>}, {pipeline_mode = #tpu.pipeline_mode<synchronous>, transform_indices = @transform_4, window_bounds = array<i64: 1, 32>}, {transform_indices = @transform_5, window_bounds = array<i64: 4, 32, 256>}]} {
    %c0 = arith.constant 0 : index
    %c0_0 = arith.constant 0 : index
    %c0_1 = arith.constant 0 : index
    %0 = vector.load %arg1[%c0, %c0_0, %c0_1] : memref<4x32x256xf32, #tpu.memory_space<vmem>>, vector<4x32x256xf32>
    %cst = arith.constant dense<0.000000e+00> : vector<4x32xf32>
    %1 = vector.multi_reduction <add>, %0, %cst [2] : vector<4x32x256xf32> to vector<4x32xf32>
    %cst_2 = arith.constant 3.906250e-03 : f32
    %2 = vector.broadcast %cst_2 : f32 to vector<4x32xf32>
    %3 = arith.mulf %1, %2 : vector<4x32xf32>
    %c0_3 = arith.constant 0 : index
    %c0_4 = arith.constant 0 : index
    %4 = vector.load %arg2[%c0_3, %c0_4] : memref<3x32xf32, #tpu.memory_space<vmem>>, vector<3x32xf32>
    %c0_5 = arith.constant 0 : index
    %c0_6 = arith.constant 0 : index
    %5 = vector.load %arg3[%c0_5, %c0_6] : memref<1x3xf32, #tpu.memory_space<vmem>>, vector<1x3xf32>
    %6 = vector.shape_cast %3 : vector<4x32xf32> to vector<4x1x32xf32>
    %7 = vector.shape_cast %4 : vector<3x32xf32> to vector<1x3x32xf32>
    %8 = vector.broadcast %6 : vector<4x1x32xf32> to vector<4x3x32xf32>
    %9 = vector.broadcast %7 : vector<1x3x32xf32> to vector<4x3x32xf32>
    %10 = arith.mulf %8, %9 : vector<4x3x32xf32>
    %cst_7 = arith.constant dense<0.000000e+00> : vector<4x3xf32>
    %11 = vector.multi_reduction <add>, %10, %cst_7 [2] : vector<4x3x32xf32> to vector<4x3xf32>
    %12 = vector.broadcast %5 : vector<1x3xf32> to vector<4x3xf32>
    %13 = arith.addf %11, %12 : vector<4x3xf32>
    %cst_8 = arith.constant 0.000000e+00 : f32
    %14 = vector.broadcast %cst_8 : f32 to vector<4x3xf32>
    %15 = arith.maximumf %13, %14 : vector<4x3xf32>
    %c0_9 = arith.constant 0 : index
    %c0_10 = arith.constant 0 : index
    %16 = vector.load %arg4[%c0_9, %c0_10] : memref<32x3xf32, #tpu.memory_space<vmem>>, vector<32x3xf32>
    %c0_11 = arith.constant 0 : index
    %c0_12 = arith.constant 0 : index
    %17 = vector.load %arg5[%c0_11, %c0_12] : memref<1x32xf32, #tpu.memory_space<vmem>>, vector<1x32xf32>
    %18 = vector.shape_cast %15 : vector<4x3xf32> to vector<4x1x3xf32>
    %19 = vector.shape_cast %16 : vector<32x3xf32> to vector<1x32x3xf32>
    %20 = vector.broadcast %18 : vector<4x1x3xf32> to vector<4x32x3xf32>
    %21 = vector.broadcast %19 : vector<1x32x3xf32> to vector<4x32x3xf32>
    %22 = arith.mulf %20, %21 : vector<4x32x3xf32>
    %cst_13 = arith.constant dense<0.000000e+00> : vector<4x32xf32>
    %23 = vector.multi_reduction <add>, %22, %cst_13 [2] : vector<4x32x3xf32> to vector<4x32xf32>
    %24 = vector.broadcast %17 : vector<1x32xf32> to vector<4x32xf32>
    %25 = arith.addf %23, %24 : vector<4x32xf32>
    %cst_14 = arith.constant 0.166666672 : f32
    %26 = vector.broadcast %cst_14 : f32 to vector<4x32xf32>
    %27 = arith.mulf %25, %26 : vector<4x32xf32>
    %cst_15 = arith.constant 5.000000e-01 : f32
    %28 = vector.broadcast %cst_15 : f32 to vector<4x32xf32>
    %29 = arith.addf %27, %28 : vector<4x32xf32>
    %cst_16 = arith.constant 0.000000e+00 : f32
    %cst_17 = arith.constant 1.000000e+00 : f32
    %30 = vector.broadcast %cst_16 : f32 to vector<4x32xf32>
    %31 = arith.maximumf %30, %29 : vector<4x32xf32>
    %32 = vector.broadcast %cst_17 : f32 to vector<4x32xf32>
    %33 = arith.minimumf %32, %31 : vector<4x32xf32>
    %34 = vector.shape_cast %33 : vector<4x32xf32> to vector<4x32x1xf32>
    %35 = vector.broadcast %34 : vector<4x32x1xf32> to vector<4x32x256xf32>
    %36 = arith.mulf %0, %35 : vector<4x32x256xf32>
    %c0_18 = arith.constant 0 : index
    %c0_19 = arith.constant 0 : index
    %c0_20 = arith.constant 0 : index
    %37 = vector.load %arg6[%c0_18, %c0_19, %c0_20] : memref<4x32x256xf32, #tpu.memory_space<vmem>>, vector<4x32x256xf32>
    tpu.vector_store %arg6[%c0_18, %c0_19, %c0_20], %36 {strides = array<i32>} : memref<4x32x256xf32, #tpu.memory_space<vmem>>, vector<4x32x256xf32>,
    return
  }
  func.func @transform_0(%arg0: i32) -> (i32, i32, i32) {
    %c0_i32 = arith.constant 0 : i32
    %c0_i32_0 = arith.constant 0 : i32
    %c0_i32_1 = arith.constant 0 : i32
    return %arg0, %c0_i32, %c0_i32_0 : i32, i32, i32
  }
  func.func @transform_1(%arg0: i32) -> (i32, i32) {
    %c0_i32 = arith.constant 0 : i32
    %c0_i32_0 = arith.constant 0 : i32
    %c0_i32_1 = arith.constant 0 : i32
    return %c0_i32, %c0_i32_0 : i32, i32
  }
  func.func @transform_2(%arg0: i32) -> (i32, i32) {
    %c0_i32 = arith.constant 0 : i32
    %c0_i32_0 = arith.constant 0 : i32
    %c0_i32_1 = arith.constant 0 : i32
    return %c0_i32, %c0_i32_0 : i32, i32
  }
  func.func @transform_3(%arg0: i32) -> (i32, i32) {
    %c0_i32 = arith.constant 0 : i32
    %c0_i32_0 = arith.constant 0 : i32
    %c0_i32_1 = arith.constant 0 : i32
    return %c0_i32, %c0_i32_0 : i32, i32
  }
  func.func @transform_4(%arg0: i32) -> (i32, i32) {
    %c0_i32 = arith.constant 0 : i32
    %c0_i32_0 = arith.constant 0 : i32
    %c0_i32_1 = arith.constant 0 : i32
    return %c0_i32, %c0_i32_0 : i32, i32
  }
  func.func @transform_5(%arg0: i32) -> (i32, i32, i32) {
    %c0_i32 = arith.constant 0 : i32
    %c0_i32_0 = arith.constant 0 : i32
    %c0_i32_1 = arith.constant 0 : i32
    return %arg0, %c0_i32, %c0_i32_0 : i32, i32, i32
  }
}

</mosaic_0001>

<bundles_post_ra>
// kernel: tpu_custom_call.1
= control target key start
LH: loop header
LB: loop body
LE: loop exit
PB: predicated region body
PF: predicated region fallthrough
CT: control target
= control target key end

     0   :  { %10 = vsyncpa [#allocation3], 0  ;;  %s4532_s0 = inlined_call_operand.hbm [shape: f32[8,32,256], index: 0, kind: input, shape index: {}]   ;;  %s4533_s1 = inlined_call_operand.vmem [shape: f32[3,32], index: 1, kind: input, shape index: {}]   ;;  %s4534_s2 = inlined_call_operand.vmem [shape: f32[1,3], index: 2, kind: input, shape index: {}]   ;;  %s4535_s3 = inlined_call_operand.vmem [shape: f32[32,3], index: 3, kind: input, shape index: {}]   ;;  %s4536_s4 = inlined_call_operand.vmem [shape: f32[1,32], index: 4, kind: input, shape index: {}]   ;;  %s4537_s5 = inlined_call_operand.hbm [shape: f32[8,32,256], index: 5, kind: output, shape index: {}]  }
   0x1   :  { %12 = vsyncpa [#allocation3 + $0x1], 0 }
   0x2   :  { %13 = vsyncpa [#allocation4], 0 }
   0x3   :  { %15 = vsyncpa [#allocation4 + $0x1], 0  ;;  %s3111_s18 = smov 0   ;;  %s3113_s19 = smov 0  }
   0x4   :  { %s3115_s20 = smov 0   ;;  %s3117_s21 = smov 0  }
   0x5 LB: > { %s3132_s22 = sadd.s32 4294967295, %s3072_s21   ;;  %s2869_s23 = sadd.s32 4294967294, %s3072_s21   ;;  %s3072_s21 = sphi %s3117_s21, %s4572_s21   ;;  %s3068_s20 = sphi %s3115_s20, %s4571_s20   ;;  %s3064_s19 = sphi %s3113_s19, %s4570_s19   ;;  %s3060_s18 = sphi %s3111_s18, %s4569_s18  }
   0x6   : > { %s3136_s24 = sadd.s32 1, %s3072_s21   ;;  %s28_s25 = sadd.s32 1, %s3068_s20 }
   0x7   : > { %s25_s26 = ssub.s32 %s3072_s21, %s3136_s24  ;;  %p35_p0 = scmp.ne.s32.totalorder %s3068_s20, %s3064_s19 }
   0x8   : > { %p26_p1 = scmp.eq.s32.totalorder %s25_s26, 0  ;;  %p36_p2 = scmp.eq.s32.totalorder %s3072_s21, 0 }
   0x9   : > { %p41_p3 = scmp.ne.s32.totalorder %s3064_s19, %s3060_s18  ;;  %p42_p4 = scmp.eq.s32.totalorder %s3132_s22, 0 }
   0xa   : > { %s3148_s27 = scalar_select %p26_p1, %s3068_s20, %s28_s25  }
   0xb   : > { %p3150_p5 = por %p36_p2, %p35_p0  ;;  %p3154_p6 = por %p42_p4, %p41_p3 }
   0xc   : > { %p149_p7 = scmp.eq.s32.totalorder %s3132_s22, 1  ;;  %p155_p8 = scmp.eq.s32.totalorder %s2869_s23, 1 }
   0xd   : > { %p2903_p10 = scmp.lt.s32.totalorder %s3072_s21, 2  ;;  %s187_s7 = sand.u32 1, %s3068_s20  }
   0xe   : > { %p3161_p11 = por %p149_p7, %p35_p0  ;;  %p3165_p12 = por %p155_p8, %p41_p3 }
   0xf   : > { %s2888_s8 = sshll.u32 %s3072_s21, 12  ;;  %s2872_s9 = sshll.u32 %s187_s7, 8 }
  0x10   : > { %s4541_s30 = scalar_select %p3161_p11, 1, 0 }
  0x11   : > { %s4542_s6 = scalar_select %p3165_p12, 1, 0 }
  0x12   : > { %s3174_s12 = scalar_lea.hbm %s4532_s0, %s2888_s8  ;;  %s191_s13 = scalar_lea.vmem [#allocation2], %s2872_s9 }
  0x13   : > { %s199_s14 = sshll.u32 %s191_s13, 4  ;;  %p3178_p13 = pnand %p2903_p10, %p3150_p5  ;;  %s3182_s14 = int_to_ptr.vmem [resolvable:$true] %s199_s14 }
  0x14   : > { %s3184_s16 = scalar_lea.sflag [#allocation3], %s187_s7  ;;  %s2976_s17 = scalar_lea.hbm %s3174_s12, 4096 }
  0x15   : > { %p2977_p0 = scmp.ne.s32.totalorder %s3174_s12, %s2976_s17  ;;  %p2978_p1 = pneg %p3178_p13 }
  0x16   : > { %s2981_s26 = scalar_lea.hbm %s4532_s0, 8192  ;;  %p2982_p4 = scmp.lt.u32.totalorder %s3174_s12, %s4532_s0 }
  0x17   : > { %p2979_p2 = pnand %p2978_p1, %p2977_p0  ;;  %p2983_p5 = scmp.lt.u32.totalorder %s2981_s26, %s2976_s17 }
  0x18   : > { %p2985_p8 = scmp.lt.u32.totalorder %s2976_s17, %s3174_s12 }
  0x19   : > { %p2980_p3 = pneg %p2979_p2  ;;  %p2984_p7 = por %p2983_p5, %p2982_p4 }
  0x1b   : > { %p2986_p10 = por %p2985_p8, %p2984_p7 }
  0x1d   : > { %p2987_p9 = pnand %p2986_p10, %p2980_p3 }
  0x1f   : > { %2990 = shalt.err (!%p2987_p9)
}
  0x20   : > { %s2991_s7 = scalar_lea.vmem %s3182_s14, 4096  ;;  %s3074_s9 = smov [#allocation2]  }
  0x21   : > { %p2992_p0 = scmp.ne.s32.totalorder %s3182_s14, %s2991_s7  ;;  %s2996_s10 = sshll.u32 %s3074_s9, 4  ;;  %s2997_s10 = int_to_ptr.vmem [resolvable:$false] %s2996_s10 }
  0x22   : > { %s2998_s11 = scalar_lea.vmem %s2997_s10, 8192  ;;  %p2999_p11 = scmp.lt.s32.totalorder %s3182_s14, %s2997_s10 }
  0x23   : > { %p2994_p2 = pnand %p2992_p0, %p2978_p1  ;;  %p3000_p4 = scmp.lt.s32.totalorder %s2998_s11, %s2991_s7 }
  0x25   : > { %p2995_p12 = pneg %p2994_p2  ;;  %p3001_p5 = por %p3000_p4, %p2999_p11 }
  0x27   : > { %p3002_p7 = pnand %p3001_p5, %p2995_p12 }
  0x29   : > { %3005 = shalt.err (!%p3002_p7)
}
  0x2a   : > { %s3075_s13 = smov 256   ;;  %s3076_s17 = smov 16  }
  0x2b   : > { %2898 = dma.hbm_to_vmem [thread:$0]  (!%p3178_p13), %s3174_s12, 4096, %s3182_s14, %s3184_s16, %s3075_s13, %s3075_s13, %s3076_s17  }
  0x2c   : > { %p2876_p9 = scmp.ge.s32.totalorder %s3072_s21, 1  ;;  %p207_p1 = scmp.lt.s32.totalorder %s3072_s21, 3 }
  0x2e   : > { %p208_p3 = pnand %p2876_p9, %p207_p1 }
  0x30   : > { %211 = sbr.rel (%p208_p3) target bundleno = 1303 (0x517), region = 40 }
  0x37   : > { %s3215_s23 = sand.u32 1, %s3064_s19  }
  0x38   : > { %s2877_s25 = sshll.u32 %s3215_s23, 8  ;;  %s214_s26 = scalar_lea.sflag [#allocation3], %s3215_s23 }
  0x39   : > { %s3221_s28 = scalar_lea.vmem [#allocation2], %s2877_s25 }
  0x3a   : > { %3051 = dma.done.wait (%p3154_p6), %s214_s26, 4096  }
  0x3b   : > { %3053 = vsyncadd (%p3154_p6), %s214_s26, 4294963200  ;;  %v250_v0 = vld [vmem:[%s3221_s28 + $0x20] sm:$0xff]  ;;  %v251_v1 = vld [vmem:[%s3221_s28 + $0x28] sm:$0xff]  ;;  %v345_v48 = vlaneseq  ;;  %v3077_v54 = vmov 0   ;;  %vm665_vm0 = vcmask 130112   ;;  %vm672_vm1 = vcmask 195712  }
  0x3c   : > { %v246_v2 = vld [vmem:[%s3221_s28] sm:$0xff]  ;;  %v284_v3 = vadd.f32 %v251_v1, %v250_v0  ;;  %v247_v4 = vld [vmem:[%s3221_s28 + $0x8] sm:$0xff]  ;;  %v252_v5 = vld [vmem:[%s3221_s28 + $0x30] sm:$0xff]  ;;  %2943 = vset.pattern.permute.xlu1 %v3077_v54  ;;  %2942 = vset.pattern.permute.xlu0 %v3077_v54  ;;  %vm679_vm2 = vcmask 261312   ;;  %vm890_vm3 = vcmask 1041409   ;;  %vm892_vm4 = vcmask 1042434  }
  0x3d   : > { %v253_v6 = vld [vmem:[%s3221_s28 + $0x38] sm:$0xff]  ;;  %v278_v7 = vadd.f32 %v247_v4, %v246_v2  ;;  %v248_v8 = vld [vmem:[%s3221_s28 + $0x10] sm:$0xff]  ;;  %v254_v14 = vld [vmem:[%s3221_s28 + $0x40] sm:$0xff]  ;;  %v3260_v49 = vshrl.u32 %v345_v48, 7  ;;  %vm904_vm5 = vcmask 256000   ;;  %vm2353_vm6 = vcmask 1043459  }
  0x3e   : > { %v249_v9 = vld [vmem:[%s3221_s28 + $0x18] sm:$0xff]  ;;  %285 = vadd.xlane.f32.xlu1 %v284_v3  ;;  %v287_v10 = vadd.f32 %v253_v6, %v252_v5  ;;  %v256_v12 = vld [vmem:[%s3221_s28 + $0x50] sm:$0xff]  ;;  %v255_v15 = vld [vmem:[%s3221_s28 + $0x48] sm:$0xff]  ;;  %vm2355_vm7 = vcmask 1044484   ;;  %vm2357_vm8 = vcmask 1045509   ;;  %vm2359_vm9 = vcmask 1046534  }
  0x3f   : > { %279 = vadd.xlane.f32.xlu0 %v278_v7  ;;  %v281_v11 = vadd.f32 %v249_v9, %v248_v8  ;;  %v257_v13 = vld [vmem:[%s3221_s28 + $0x58] sm:$0xff]  ;;  %v290_v17 = vadd.f32 %v255_v15, %v254_v14  ;;  %v260_v18 = vld [vmem:[%s3221_s28 + $0x70] sm:$0xff]  ;;  %v258_v20 = vld [vmem:[%s3221_s28 + $0x60] sm:$0xff]  ;;  %v3263_v50 = vsub.s32 0, %v3260_v49  ;;  %v3270_v53 = vsub.s32 1, %v3260_v49  ;;  %s4419_s12 = scalar_lea.vmem [#allocation5], %s2877_s25 }
  0x40   : > { %v293_v16 = vadd.f32 %v257_v13, %v256_v12  ;;  %v261_v19 = vld [vmem:[%s3221_s28 + $0x78] sm:$0xff]  ;;  %v259_v21 = vld [vmem:[%s3221_s28 + $0x68] sm:$0xff]  ;;  %v264_v24 = vld [vmem:[%s3221_s28 + $0x90] sm:$0xff]  ;;  %v3274_v56 = vsub.s32 2, %v3260_v49  ;;  %vm2361_vm10 = vcmask 1047559   ;;  %vm2484_vm11 = vcmask 23552  }
  0x41   : > { %v299_v22 = vadd.f32 %v261_v19, %v260_v18  ;;  %v296_v23 = vadd.f32 %v259_v21, %v258_v20  ;;  %v265_v25 = vld [vmem:[%s3221_s28 + $0x98] sm:$0xff]  ;;  %v262_v26 = vld [vmem:[%s3221_s28 + $0x80] sm:$0xff]  ;;  %v263_v27 = vld [vmem:[%s3221_s28 + $0x88] sm:$0xff]  ;;  %s2890_s25 = sshll.u32 %s3132_s22, 12  ;;  %s2796_s14 = sshll.u32 %s4419_s12, 4  ;;  %s4480_s14 = int_to_ptr.vmem [resolvable:$true] %s2796_s14 }
  0x42   : > { %288 = vadd.xlane.f32.xlu1 %v287_v10  ;;  %v305_v28 = vadd.f32 %v265_v25, %v264_v24  ;;  %v302_v29 = vadd.f32 %v263_v27, %v262_v26  ;;  %v268_v30 = vld [vmem:[%s3221_s28 + $0xb0] sm:$0xff]  ;;  %v269_v31 = vld [vmem:[%s3221_s28 + $0xb8] sm:$0xff]  ;;  %v266_v32 = vld [vmem:[%s3221_s28 + $0xa0] sm:$0xff]  ;;  %s4478_s8 = scalar_lea.hbm %s4537_s5, %s2890_s25  ;;  %s2782_s22 = scalar_lea.sflag [#allocation4], %s3215_s23 }
  0x43   : > { %282 = vadd.xlane.f32.xlu0 %v281_v11  ;;  %v267_v33 = vld [vmem:[%s3221_s28 + $0xa8] sm:$0xff]  ;;  %v311_v34 = vadd.f32 %v269_v31, %v268_v30  ;;  %v272_v36 = vld [vmem:[%s3221_s28 + $0xd0] sm:$0xff]  ;;  %v273_v37 = vld [vmem:[%s3221_s28 + $0xd8] sm:$0xff]  ;;  %s3006_s7 = scalar_lea.vmem %s4480_s14, 4096  ;;  %p4566_p11 = scmp.ne.s32.totalorder %s4541_s30, 0 }
  0x44   : > { %v308_v35 = vadd.f32 %v267_v33, %v266_v32  ;;  %v270_v38 = vld [vmem:[%s3221_s28 + $0xc0] sm:$0xff]  ;;  %v271_v39 = vld [vmem:[%s3221_s28 + $0xc8] sm:$0xff]  ;;  %v317_v40 = vadd.f32 %v273_v37, %v272_v36  ;;  %v276_v42 = vld [vmem:[%s3221_s28 + $0xf0] sm:$0xff]  ;;  %p3007_p6 = scmp.ne.s32.totalorder %s4480_s14, %s3006_s7  ;;  %s3078_s9 = smov [#allocation5]  }
  0x45   : > { %v314_v41 = vadd.f32 %v271_v39, %v270_v38  ;;  %v277_v43 = vld [vmem:[%s3221_s28 + $0xf8] sm:$0xff]  ;;  %v274_v44 = vld [vmem:[%s3221_s28 + $0xe0] sm:$0xff]  ;;  %v275_v45 = vld [vmem:[%s3221_s28 + $0xe8] sm:$0xff]  ;;  %s3010_s10 = sshll.u32 %s3078_s9, 4  ;;  %s3011_s10 = int_to_ptr.vmem [resolvable:$false] %s3010_s10 }
  0x46   : > { %294 = vadd.xlane.f32.xlu1 %v293_v16  ;;  %v323_v46 = vadd.f32 %v277_v43, %v276_v42  ;;  %v320_v47 = vadd.f32 %v275_v45, %v274_v44  ;;  %v342_v51 = vld [vmem:[%s4533_s1] sm:$0x7]  ;;  %p3008_p12 = pnand %p3007_p6, %p4566_p11  ;;  %s3012_s11 = scalar_lea.vmem %s3011_s10, 8192 }
  0x47   : > { %291 = vadd.xlane.f32.xlu0 %v290_v17  ;;  %v348_v52 = vrot.slane %v342_v51, %v3263_v50  ;;  %v367_v55 = vrot.slane %v342_v51, %v3270_v53  ;;  %v386_v57 = vrot.slane %v342_v51, %v3274_v56  ;;  %p3013_p8 = scmp.lt.s32.totalorder %s4480_s14, %s3011_s10  ;;  %p3014_p10 = scmp.lt.s32.totalorder %s3012_s11, %s3006_s7 }
  0x48   : > { %p3009_p13 = pneg %p3008_p12 }
  0x49   : > { %p3015_p0 = por %p3014_p10, %p3013_p8 }
  0x4a   : > { %300 = vadd.xlane.f32.xlu1 %v299_v22 }
  0x4b   : > { %297 = vadd.xlane.f32.xlu0 %v296_v23  ;;  %p3016_p2 = pnand %p3015_p0, %p3009_p13 }
  0x4e   : > { %306 = vadd.xlane.f32.xlu1 %v305_v28 }
  0x4f   : > { %303 = vadd.xlane.f32.xlu0 %v302_v29 }
  0x52   : > { %312 = vadd.xlane.f32.xlu1 %v311_v34 }
  0x53   : > { %309 = vadd.xlane.f32.xlu0 %v308_v35 }
  0x56   : > { %318 = vadd.xlane.f32.xlu1 %v317_v40 }
  0x57   : > { %315 = vadd.xlane.f32.xlu0 %v314_v41 }
  0x5a   : > { %324 = vadd.xlane.f32.xlu1 %v323_v46 }
  0x5b   : > { %321 = vadd.xlane.f32.xlu0 %v320_v47 }
  0x6b   : > { %354 = vbcast.lane.b32.xlu1 %v348_v52, 264 }
  0x6f   : > { %358 = vbcast.lane.b32.xlu1 %v348_v52, 272 }
  0x71   : > { %350 = vbcast.lane.b32.xlu0 %v348_v52, 256 }
  0x73   : > { %362 = vbcast.lane.b32.xlu1 %v348_v52, 280 }
  0x75   : > { %369 = vbcast.lane.b32.xlu0 %v367_v55, 256 }
  0x77   : > { %373 = vbcast.lane.b32.xlu1 %v367_v55, 264 }
  0x79   : > { %377 = vbcast.lane.b32.xlu0 %v367_v55, 272 }
  0x7b   : > { %381 = vbcast.lane.b32.xlu1 %v367_v55, 280 }
  0x7d   : > { %388 = vbcast.lane.b32.xlu0 %v386_v57, 256 }
  0x7f   : > { %392 = vbcast.lane.b32.xlu1 %v386_v57, 264 }
  0x81   : > { %396 = vbcast.lane.b32.xlu0 %v386_v57, 272 }
  0x83   : > { %400 = vbcast.lane.b32.xlu1 %v386_v57, 280 }
  0xcb   : > { %v286_v58 = vpop.xlane.xlu1 %285 }
  0xcc   : > { %v280_v59 = vpop.xlane.xlu0 %279  ;;  %v328_v16 = vmul.f32 0.00390625, %v286_v58 }
  0xcd   : > { %v326_v11 = vmul.f32 0.00390625, %v280_v59 }
  0xcf   : > { %v289_v60 = vpop.xlane.xlu1 %288 }
  0xd0   : > { %v283_v61 = vpop.xlane.xlu0 %282  ;;  %v329_v20 = vmul.f32 0.00390625, %v289_v60 }
  0xd1   : > { %v327_v10 = vmul.f32 0.00390625, %v283_v61 }
  0xd3   : > { %v295_v62 = vpop.xlane.xlu1 %294 }
  0xd4   : > { %v292_v63 = vpop.xlane.xlu0 %291  ;;  %v331_v40 = vmul.f32 0.00390625, %v295_v62 }
  0xd5   : > { %v330_v36 = vmul.f32 0.00390625, %v292_v63 }
  0xd7   : > { %v301_v0 = vpop.xlane.xlu1 %300 }
  0xd8   : > { %v298_v1 = vpop.xlane.xlu0 %297  ;;  %v333_v44 = vmul.f32 0.00390625, %v301_v0 }
  0xd9   : > { %v332_v41 = vmul.f32 0.00390625, %v298_v1 }
  0xdb   : > { %v3277_v2 = vpop.xlane.xlu1 %306 }
  0xdc   : > { %v3279_v3 = vpop.xlane.xlu0 %303  ;;  %v335_v61 = vmul.f32 0.00390625, %v3277_v2 }
  0xdd   : > { %v334_v58 = vmul.f32 0.00390625, %v3279_v3 }
  0xdf   : > { %v3281_v4 = vpop.xlane.xlu1 %312 }
  0xe0   : > { %v3283_v5 = vpop.xlane.xlu0 %309  ;;  %v337_v1 = vmul.f32 0.00390625, %v3281_v4 }
  0xe1   : > { %v336_v62 = vmul.f32 0.00390625, %v3283_v5 }
  0xe3   : > { %v3285_v6 = vpop.xlane.xlu1 %318 }
  0xe4   : > { %v3287_v7 = vpop.xlane.xlu0 %315 }
  0xe7   : > { %v3289_v8 = vpop.xlane.xlu1 %324 }
  0xe8   : > { %v3291_v9 = vpop.xlane.xlu0 %321 }
  0xeb   : > { %v3293_v12 = vpop.permute.xlu1 %354 }
  0xec   : > { %v3295_v13 = vpop.permute.xlu0 %350  ;;  %v415_v14 = vmul.f32 %v3293_v12, %v327_v10  ;;  %v427_v42 = vmul.f32 %v3293_v12, %v331_v40  ;;  %v439_v63 = vmul.f32 %v3293_v12, %v335_v61 }
  0xed   : > { %v414_v15 = vmul.f32 %v3295_v13, %v326_v11  ;;  %v426_v39 = vmul.f32 %v3295_v13, %v330_v36  ;;  %v438_v60 = vmul.f32 %v3295_v13, %v334_v58 }
  0xee   : > { %514 = vperm.xlu1 %2943, %v415_v14  }
  0xef   : > { %511 = vperm.xlu0 %2942, %v414_v15   ;;  %v3299_v17 = vpop.permute.xlu1 %358 }
  0xf0   : > { %v3301_v18 = vpop.permute.xlu0 %369  ;;  %v416_v19 = vmul.f32 %v3299_v17, %v328_v16  ;;  %v428_v43 = vmul.f32 %v3299_v17, %v332_v41  ;;  %v440_v0 = vmul.f32 %v3299_v17, %v336_v62 }
  0xf1   : > { %v418_v24 = vmul.f32 %v3301_v18, %v326_v11  ;;  %v430_v46 = vmul.f32 %v3301_v18, %v330_v36 }
  0xf2   : > { %517 = vperm.xlu1 %2943, %v416_v19  }
  0xf3   : > { %v3304_v21 = vpop.permute.xlu1 %362 }
  0xf4   : > { %v3306_v22 = vpop.permute.xlu0 %377  ;;  %v417_v23 = vmul.f32 %v3304_v21, %v329_v20  ;;  %v429_v45 = vmul.f32 %v3304_v21, %v333_v44  ;;  %v441_v3 = vmul.f32 %v3304_v21, %v337_v1 }
  0xf5   : > { %v420_v28 = vmul.f32 %v3306_v22, %v328_v16  ;;  %v432_v51 = vmul.f32 %v3306_v22, %v332_v41  ;;  %v444_v5 = vmul.f32 %v3306_v22, %v336_v62 }
  0xf6   : > { %520 = vperm.xlu0 %2942, %v417_v23   ;;  %523 = vperm.xlu1 %2943, %v418_v24   ;;  %v339_v23 = vmul.f32 0.00390625, %v3285_v6  ;;  %v340_v24 = vmul.f32 0.00390625, %v3291_v9 }
  0xf7   : > { %v3310_v25 = vpop.permute.xlu1 %373 }
  0xf8   : > { %v3312_v26 = vpop.permute.xlu0 %388  ;;  %v419_v27 = vmul.f32 %v3310_v25, %v327_v10  ;;  %v431_v47 = vmul.f32 %v3310_v25, %v331_v40  ;;  %v443_v2 = vmul.f32 %v3310_v25, %v335_v61  ;;  %v455_v6 = vmul.f32 %v3310_v25, %v339_v23 }
  0xf9   : > { %v422_v31 = vmul.f32 %v3312_v26, %v326_v11  ;;  %v434_v54 = vmul.f32 %v3312_v26, %v330_v36  ;;  %v446_v14 = vmul.f32 %v3312_v26, %v334_v58  ;;  %v456_v9 = vmul.f32 %v3306_v22, %v340_v24 }
  0xfa   : > { %526 = vperm.xlu0 %2942, %v419_v27   ;;  %529 = vperm.xlu1 %2943, %v420_v28   ;;  %v451_v27 = vmul.f32 %v3293_v12, %v339_v23  ;;  %v452_v28 = vmul.f32 %v3299_v17, %v340_v24 }
  0xfb   : > { %v3316_v29 = vpop.permute.xlu1 %381 }
  0xfc   : > { %v421_v30 = vmul.f32 %v3316_v29, %v329_v20  ;;  %v3320_v32 = vpop.permute.xlu0 %396  ;;  %v433_v52 = vmul.f32 %v3316_v29, %v333_v44  ;;  %v445_v11 = vmul.f32 %v3316_v29, %v337_v1 }
  0xfd   : > { %v424_v35 = vmul.f32 %v3320_v32, %v328_v16  ;;  %v436_v57 = vmul.f32 %v3320_v32, %v332_v41  ;;  %v448_v15 = vmul.f32 %v3320_v32, %v336_v62  ;;  %v338_v16 = vmul.f32 0.00390625, %v3287_v7 }
  0xfe   : > { %532 = vperm.xlu0 %2942, %v421_v30   ;;  %535 = vperm.xlu1 %2943, %v422_v31   ;;  %v341_v30 = vmul.f32 0.00390625, %v3289_v8  ;;  %v460_v17 = vmul.f32 %v3320_v32, %v340_v24 }
  0xff   : > { %v3322_v33 = vpop.permute.xlu1 %392  ;;  %v454_v31 = vmul.f32 %v3301_v18, %v338_v16 }
 0x100   : > { %v423_v34 = vmul.f32 %v3322_v33, %v327_v10  ;;  %v435_v55 = vmul.f32 %v3322_v33, %v331_v40  ;;  %v442_v10 = vmul.f32 %v3301_v18, %v334_v58  ;;  %v447_v4 = vmul.f32 %v3322_v33, %v335_v61  ;;  %v2879_v18 = vld [vmem:[%s4534_s2] ss:$0 sm:$0xff] }
 0x101   : > { %v453_v7 = vmul.f32 %v3304_v21, %v341_v30  ;;  %v457_v12 = vmul.f32 %v3316_v29, %v341_v30  ;;  %v459_v8 = vmul.f32 %v3322_v33, %v339_v23  ;;  %v934_v21 = vld [vmem:[%s4535_s3] sm:$0xff]  ;;  %v3382_v29 = vsub.s32 4, %v3260_v49 }
 0x102   : > { %538 = vperm.xlu0 %2942, %v423_v34   ;;  %541 = vperm.xlu1 %2943, %v424_v35   ;;  %v946_v25 = vrot.slane %v934_v21, %v3263_v50  ;;  %v960_v33 = vrot.slane %v934_v21, %v3274_v56  ;;  %v3387_v34 = vsub.s32 6, %v3260_v49  ;;  %v3390_v35 = vsub.s32 3, %v3260_v49 }
 0x103   : > { %v3326_v37 = vpop.permute.xlu1 %400  ;;  %v974_v32 = vrot.slane %v934_v21, %v3382_v29 }
 0x104   : > { %v425_v38 = vmul.f32 %v3326_v37, %v329_v20  ;;  %v437_v59 = vmul.f32 %v3326_v37, %v333_v44  ;;  %v449_v19 = vmul.f32 %v3326_v37, %v337_v1  ;;  %v450_v20 = vmul.f32 %v3295_v13, %v338_v16 }
 0x105   : > { %v458_v13 = vmul.f32 %v3312_v26, %v338_v16  ;;  %v461_v22 = vmul.f32 %v3326_v37, %v341_v30  ;;  %v953_v26 = vrot.slane %v934_v21, %v3270_v53  ;;  %v988_v36 = vrot.slane %v934_v21, %v3387_v34 }
 0x106   : > { %544 = vperm.xlu0 %2942, %v425_v38   ;;  %547 = vperm.xlu1 %2943, %v426_v39   ;;  %v967_v37 = vrot.slane %v934_v21, %v3390_v35  ;;  %v3395_v38 = vsub.s32 5, %v3260_v49  ;;  %v935_v39 = vld [vmem:[%s4535_s3 + $0x8] sm:$0xff] }
 0x107   : > { %v1002_v40 = vrot.slane %v935_v39, %v3263_v50 }
 0x108   : > { %v981_v41 = vrot.slane %v934_v21, %v3395_v38 }
 0x10a   : > { %550 = vperm.xlu0 %2942, %v427_v42   ;;  %553 = vperm.xlu1 %2943, %v428_v43   ;;  %v3403_v42 = vsub.s32 7, %v3260_v49  ;;  %v1016_v43 = vrot.slane %v935_v39, %v3274_v56 }
 0x10c   : > { %v995_v44 = vrot.slane %v934_v21, %v3403_v42 }
 0x10e   : > { %556 = vperm.xlu0 %2942, %v429_v45   ;;  %559 = vperm.xlu1 %2943, %v430_v46   ;;  %v1030_v45 = vrot.slane %v935_v39, %v3382_v29  ;;  %v1009_v46 = vrot.slane %v935_v39, %v3270_v53 }
 0x112   : > { %562 = vperm.xlu0 %2942, %v431_v47   ;;  %565 = vperm.xlu1 %2943, %v432_v51   ;;  %v1044_v47 = vrot.slane %v935_v39, %v3387_v34  ;;  %v1023_v51 = vrot.slane %v935_v39, %v3390_v35 }
 0x116   : > { %568 = vperm.xlu0 %2942, %v433_v52   ;;  %571 = vperm.xlu1 %2943, %v434_v54   ;;  %v936_v52 = vld [vmem:[%s4535_s3 + $0x10] sm:$0xff] }
 0x117   : > { %v1058_v54 = vrot.slane %v936_v52, %v3263_v50  ;;  %v1072_v58 = vrot.slane %v936_v52, %v3274_v56  ;;  %v1086_v62 = vrot.slane %v936_v52, %v3382_v29 }
 0x11a   : > { %574 = vperm.xlu0 %2942, %v435_v55   ;;  %577 = vperm.xlu1 %2943, %v436_v57   ;;  %v1037_v55 = vrot.slane %v935_v39, %v3395_v38 }
 0x11e   : > { %580 = vperm.xlu0 %2942, %v437_v59   ;;  %583 = vperm.xlu1 %2943, %v438_v60   ;;  %v1051_v59 = vrot.slane %v935_v39, %v3403_v42 }
 0x122   : > { %586 = vperm.xlu0 %2942, %v439_v63   ;;  %589 = vperm.xlu1 %2943, %v440_v0   ;;  %v1065_v63 = vrot.slane %v936_v52, %v3270_v53 }
 0x126   : > { %592 = vperm.xlu0 %2942, %v441_v3   ;;  %595 = vperm.xlu1 %2943, %v442_v10   ;;  %v1100_v3 = vrot.slane %v936_v52, %v3387_v34  ;;  %v1079_v10 = vrot.slane %v936_v52, %v3390_v35 }
 0x12a   : > { %598 = vperm.xlu0 %2942, %v443_v2   ;;  %601 = vperm.xlu1 %2943, %v444_v5   ;;  %v937_v2 = vld [vmem:[%s4535_s3 + $0x18] sm:$0xff] }
 0x12e   : > { %604 = vperm.xlu0 %2942, %v445_v11   ;;  %607 = vperm.xlu1 %2943, %v446_v14   ;;  %v1114_v14 = vrot.slane %v937_v2, %v3263_v50  ;;  %v1142_v50 = vrot.slane %v937_v2, %v3382_v29 }
 0x132   : > { %610 = vperm.xlu0 %2942, %v447_v4   ;;  %613 = vperm.xlu1 %2943, %v448_v15   ;;  %v1093_v4 = vrot.slane %v936_v52, %v3395_v38 }
 0x136   : > { %616 = vperm.xlu0 %2942, %v449_v19   ;;  %619 = vperm.xlu1 %2943, %v450_v20   ;;  %v1128_v19 = vrot.slane %v937_v2, %v3274_v56  ;;  %v1107_v20 = vrot.slane %v936_v52, %v3403_v42  ;;  %v1135_v56 = vrot.slane %v937_v2, %v3390_v35 }
 0x13a   : > { %622 = vperm.xlu0 %2942, %v451_v27   ;;  %625 = vperm.xlu1 %2943, %v452_v28   ;;  %v1121_v27 = vrot.slane %v937_v2, %v3270_v53  ;;  %v1163_v53 = vrot.slane %v937_v2, %v3403_v42 }
 0x13e   : > { %628 = vperm.xlu0 %2942, %v453_v7   ;;  %631 = vperm.xlu1 %2943, %v454_v31   ;;  %v1156_v7 = vrot.slane %v937_v2, %v3387_v34 }
 0x142   : > { %634 = vperm.xlu0 %2942, %v455_v6   ;;  %637 = vperm.xlu1 %2943, %v456_v9   ;;  %v1149_v9 = vrot.slane %v937_v2, %v3395_v38 }
 0x146   : > { %640 = vperm.xlu0 %2942, %v457_v12   ;;  %643 = vperm.xlu1 %2943, %v458_v13  }
 0x14a   : > { %646 = vperm.xlu0 %2942, %v459_v8   ;;  %649 = vperm.xlu1 %2943, %v460_v17   ;;  %v655_v8 = vand.u32 127, %v345_v48 }
 0x14c   : > { %v660_v21 = vadd.s32 4294967288, %v655_v8 }
 0x14e   : > { %652 = vperm.xlu0 %2942, %v461_v22   ;;  %923 = vbcast.lane.b32.xlu1 %v2879_v18, 256  ;;  %v3461_v29 = vsub.s32 %v660_v21, %v3260_v49 }
 0x152   : > { %948 = vbcast.lane.b32.xlu0 %v946_v25, 256  ;;  %955 = vbcast.lane.b32.xlu1 %v953_v26, 256  ;;  %v667_v26 = vadd.s32 4294967280, %v655_v8 }
 0x154   : > { %v3468_v48 = vsub.s32 %v667_v26, %v3260_v49 }
 0x156   : > { %976 = vbcast.lane.b32.xlu0 %v974_v32, 256  ;;  %962 = vbcast.lane.b32.xlu1 %v960_v33, 256  ;;  %v674_v32 = vadd.s32 4294967272, %v655_v8  ;;  %v3464_v33 = vsub.s32 %v655_v8, %v3260_v49 }
 0x158   : > { %v3472_v38 = vsub.s32 %v674_v32, %v3260_v49 }
 0x15a   : > { %990 = vbcast.lane.b32.xlu0 %v988_v36, 256  ;;  %969 = vbcast.lane.b32.xlu1 %v967_v37, 256 }
 0x15e   : > { %1004 = vbcast.lane.b32.xlu0 %v1002_v40, 256  ;;  %983 = vbcast.lane.b32.xlu1 %v981_v41, 256 }
 0x162   : > { %1018 = vbcast.lane.b32.xlu0 %v1016_v43, 256  ;;  %997 = vbcast.lane.b32.xlu1 %v995_v44, 256 }
 0x166   : > { %1032 = vbcast.lane.b32.xlu0 %v1030_v45, 256  ;;  %1011 = vbcast.lane.b32.xlu1 %v1009_v46, 256 }
 0x16a   : > { %1046 = vbcast.lane.b32.xlu0 %v1044_v47, 256  ;;  %1025 = vbcast.lane.b32.xlu1 %v1023_v51, 256 }
 0x16d   : > { %v3416_v57 = vpop.permute.xlu1 %514 }
 0x16e   : > { %1060 = vbcast.lane.b32.xlu0 %v1058_v54, 256  ;;  %1039 = vbcast.lane.b32.xlu1 %v1037_v55, 256  ;;  %v3420_v60 = vpop.permute.xlu0 %511 }
 0x171   : > { %v3422_v61 = vpop.permute.xlu1 %517 }
 0x172   : > { %1074 = vbcast.lane.b32.xlu0 %v1072_v58, 256  ;;  %1053 = vbcast.lane.b32.xlu1 %v1051_v59, 256 }
 0x175   : > { %v3426_v0 = vpop.permute.xlu1 %523  ;;  %v3428_v1 = vpop.permute.xlu0 %520 }
 0x176   : > { %1088 = vbcast.lane.b32.xlu0 %v1086_v62, 256  ;;  %1067 = vbcast.lane.b32.xlu1 %v1065_v63, 256 }
 0x179   : > { %v3435_v5 = vpop.permute.xlu1 %529  ;;  %v3437_v11 = vpop.permute.xlu0 %526 }
 0x17a   : > { %1102 = vbcast.lane.b32.xlu0 %v1100_v3, 256  ;;  %1081 = vbcast.lane.b32.xlu1 %v1079_v10, 256 }
 0x17d   : > { %v3441_v15 = vpop.permute.xlu1 %535  ;;  %v3443_v16 = vpop.permute.xlu0 %532 }
 0x17e   : > { %1116 = vbcast.lane.b32.xlu0 %v1114_v14, 256  ;;  %1095 = vbcast.lane.b32.xlu1 %v1093_v4, 256 }
 0x181   : > { %v3447_v23 = vpop.permute.xlu1 %541  ;;  %v3449_v24 = vpop.permute.xlu0 %538 }
 0x182   : > { %1130 = vbcast.lane.b32.xlu0 %v1128_v19, 256  ;;  %1109 = vbcast.lane.b32.xlu1 %v1107_v20, 256 }
 0x185   : > { %v548_v28 = vpop.permute.xlu1 %547  ;;  %v3453_v30 = vpop.permute.xlu0 %544 }
 0x186   : > { %1144 = vbcast.lane.b32.xlu0 %v1142_v50, 256  ;;  %1123 = vbcast.lane.b32.xlu1 %v1121_v27, 256  ;;  %v722_v43 = vrot.slane %v548_v28, %v3464_v33  ;;  %v688_v28 = vrot.slane %v3437_v11, %v3461_v29 }
 0x189   : > { %v554_v31 = vpop.permute.xlu1 %553  ;;  %v551_v6 = vpop.permute.xlu0 %550 }
 0x18a   : > { %1158 = vbcast.lane.b32.xlu0 %v1156_v7, 256  ;;  %1137 = vbcast.lane.b32.xlu1 %v1135_v56, 256  ;;  %v726_v39 = vrot.slane %v551_v6, %v3461_v29  ;;  %v731_v51 = vrot.slane %v554_v31, %v3468_v48  ;;  %v707_v7 = vrot.slane %v3449_v24, %v3461_v29 }
 0x18b   : > { %v684_v56 = vrot.slane %v3426_v0, %v3464_v33  ;;  %v664_v6 = vrot.slane %v3416_v57, %v3461_v29  ;;  %v659_v24 = vrot.slane %v3420_v60, %v3464_v33  ;;  %v698_v0 = vrot.slane %v3443_v16, %v3472_v38 }
 0x18c   : > { %v727_v55 = vsel %vm665_vm0, %v726_v39, %v722_v43  ;;  %v712_v57 = vrot.slane %v3447_v23, %v3468_v48 }
 0x18d   : > { %v560_v12 = vpop.permute.xlu1 %559  ;;  %v557_v13 = vpop.permute.xlu0 %556  ;;  %v732_v2 = vsel %vm672_vm1, %v731_v51, %v727_v55 }
 0x18e   : > { %1151 = vbcast.lane.b32.xlu1 %v1149_v9, 256  ;;  %v741_v40 = vrot.slane %v560_v12, %v3464_v33  ;;  %v736_v58 = vrot.slane %v557_v13, %v3472_v38  ;;  %v693_v9 = vrot.slane %v3435_v5, %v3468_v48  ;;  %v703_v12 = vrot.slane %v3441_v15, %v3464_v33 }
 0x18f   : > { %v671_v5 = vrot.slane %v3422_v61, %v3468_v48  ;;  %v717_v15 = vrot.slane %v3453_v30, %v3472_v38 }
 0x190   : > { %v737_v4 = vsel %vm679_vm2, %v736_v58, %v732_v2  ;;  %v708_v8 = vsel %vm665_vm0, %v707_v7, %v703_v12 }
 0x191   : > { %v566_v17 = vpop.permute.xlu1 %565  ;;  %v563_v18 = vpop.permute.xlu0 %562  ;;  %v713_v61 = vsel %vm672_vm1, %v712_v57, %v708_v8 }
 0x192   : > { %1165 = vbcast.lane.b32.xlu1 %v1163_v53, 256  ;;  %v745_v34 = vrot.slane %v563_v18, %v3461_v29  ;;  %v750_v41 = vrot.slane %v566_v17, %v3468_v48  ;;  %v689_v53 = vsel %vm665_vm0, %v688_v28, %v684_v56  ;;  %v678_v17 = vrot.slane %v3428_v1, %v3472_v38 }
 0x193   : > { %v694_v60 = vsel %vm672_vm1, %v693_v9, %v689_v53  ;;  %v718_v1 = vsel %vm679_vm2, %v717_v15, %v713_v61 }
 0x194   : > { %v746_v44 = vsel %vm665_vm0, %v745_v34, %v741_v40  ;;  %v699_v23 = vsel %vm679_vm2, %v698_v0, %v694_v60 }
 0x195   : > { %v572_v22 = vpop.permute.xlu1 %571  ;;  %v569_v25 = vpop.permute.xlu0 %568  ;;  %v751_v59 = vsel %vm672_vm1, %v750_v41, %v746_v44 }
 0x196   : > { %v760_v42 = vrot.slane %v572_v22, %v3464_v33  ;;  %v755_v45 = vrot.slane %v569_v25, %v3472_v38  ;;  %v666_v22 = vsel %vm665_vm0, %v664_v6, %v659_v24 }
 0x197   : > { %v673_v25 = vsel %vm672_vm1, %v671_v5, %v666_v22 }
 0x198   : > { %v756_v62 = vsel %vm679_vm2, %v755_v45, %v751_v59  ;;  %v680_v32 = vsel %vm679_vm2, %v678_v17, %v673_v25 }
 0x199   : > { %v578_v35 = vpop.permute.xlu1 %577  ;;  %v575_v36 = vpop.permute.xlu0 %574  ;;  %v894_v19 = vsel %vm890_vm3, %v756_v62, %v737_v4  ;;  %v891_v41 = vsel %vm890_vm3, %v699_v23, %v680_v32 }
 0x19a   : > { %v764_v37 = vrot.slane %v575_v36, %v3461_v29  ;;  %v769_v46 = vrot.slane %v578_v35, %v3468_v48  ;;  %v893_v45 = vsel %vm892_vm4, %v718_v1, %v891_v41 }
 0x19b   : > { %v905_v59 = vsel %vm904_vm5, %v893_v45, 0.0 }
 0x19c   : > { %v765_v52 = vsel %vm665_vm0, %v764_v37, %v760_v42 }
 0x19d   : > { %v3482_v47 = vpop.permute.xlu1 %583  ;;  %v581_v49 = vpop.permute.xlu0 %580  ;;  %v770_v10 = vsel %vm672_vm1, %v769_v46, %v765_v52 }
 0x19e   : > { %v774_v54 = vrot.slane %v581_v49, %v3472_v38  ;;  %v779_v35 = vrot.slane %v3482_v47, %v3464_v33 }
 0x1a0   : > { %v775_v14 = vsel %vm679_vm2, %v774_v54, %v770_v10 }
 0x1a1   : > { %v3491_v63 = vpop.permute.xlu1 %589  ;;  %v587_v3 = vpop.permute.xlu0 %586  ;;  %v895_v27 = vsel %vm892_vm4, %v775_v14, %v894_v19 }
 0x1a2   : > { %v908_v31 = vsel %vm904_vm5, %v895_v27, 0.0  ;;  %v783_v26 = vrot.slane %v587_v3, %v3461_v29  ;;  %v788_v42 = vrot.slane %v3491_v63, %v3468_v48 }
 0x1a4   : > { %v784_v46 = vsel %vm665_vm0, %v783_v26, %v779_v35 }
 0x1a5   : > { %v596_v20 = vpop.permute.xlu1 %595  ;;  %v593_v50 = vpop.permute.xlu0 %592  ;;  %v789_v62 = vsel %vm672_vm1, %v788_v42, %v784_v46 }
 0x1a6   : > { %v798_v30 = vrot.slane %v596_v20, %v3464_v33  ;;  %v793_v47 = vrot.slane %v593_v50, %v3472_v38 }
 0x1a8   : > { %v794_v3 = vsel %vm679_vm2, %v793_v47, %v789_v62 }
 0x1a9   : > { %v602_v13 = vpop.permute.xlu1 %601  ;;  %909 = vadd.xlane.f32.xlu0 %v908_v31  ;;  %v599_v11 = vpop.permute.xlu0 %598 }
 0x1aa   : > { %v802_v18 = vrot.slane %v599_v11, %v3461_v29  ;;  %v807_v34 = vrot.slane %v602_v13, %v3468_v48 }
 0x1ac   : > { %v803_v36 = vsel %vm665_vm0, %v802_v18, %v798_v30 }
 0x1ad   : > { %v608_v21 = vpop.permute.xlu1 %607  ;;  %v605_v16 = vpop.permute.xlu0 %604  ;;  %v808_v51 = vsel %vm672_vm1, %v807_v34, %v803_v36 }
 0x1ae   : > { %v812_v37 = vrot.slane %v605_v16, %v3472_v38  ;;  %v817_v43 = vrot.slane %v608_v21, %v3464_v33 }
 0x1b0   : > { %v813_v54 = vsel %vm679_vm2, %v812_v37, %v808_v51 }
 0x1b1   : > { %v614_v39 = vpop.permute.xlu1 %613  ;;  %v611_v40 = vpop.permute.xlu0 %610  ;;  %v896_v14 = vsel %vm890_vm3, %v813_v54, %v794_v3 }
 0x1b2   : > { %v821_v44 = vrot.slane %v611_v40, %v3461_v29  ;;  %v826_v49 = vrot.slane %v614_v39, %v3468_v48 }
 0x1b4   : > { %v822_v52 = vsel %vm665_vm0, %v821_v44, %v817_v43 }
 0x1b5   : > { %v620_v55 = vpop.permute.xlu1 %619  ;;  %v617_v58 = vpop.permute.xlu0 %616  ;;  %v827_v10 = vsel %vm672_vm1, %v826_v49, %v822_v52 }
 0x1b6   : > { %v831_v63 = vrot.slane %v617_v58, %v3472_v38  ;;  %906 = vadd.xlane.f32.xlu1 %v905_v59  ;;  %v836_v24 = vrot.slane %v620_v55, %v3464_v33 }
 0x1b8   : > { %v832_v2 = vsel %vm679_vm2, %v831_v63, %v827_v10 }
 0x1b9   : > { %v626_v4 = vpop.permute.xlu1 %625  ;;  %v623_v19 = vpop.permute.xlu0 %622  ;;  %v897_v20 = vsel %vm892_vm4, %v832_v2, %v896_v14 }
 0x1ba   : > { %v911_v50 = vsel %vm904_vm5, %v897_v20, 0.0  ;;  %v840_v12 = vrot.slane %v623_v19, %v3461_v29  ;;  %v845_v8 = vrot.slane %v626_v4, %v3468_v48 }
 0x1bb   : > { %912 = vadd.xlane.f32.xlu0 %v911_v50 }
 0x1bc   : > { %v841_v60 = vsel %vm665_vm0, %v840_v12, %v836_v24 }
 0x1bd   : > { %v632_v27 = vpop.permute.xlu1 %631  ;;  %v629_v28 = vpop.permute.xlu0 %628  ;;  %v846_v25 = vsel %vm672_vm1, %v845_v8, %v841_v60 }
 0x1be   : > { %v855_v13 = vrot.slane %v632_v27, %v3464_v33  ;;  %v850_v18 = vrot.slane %v629_v28, %v3472_v38 }
 0x1c0   : > { %v851_v30 = vsel %vm679_vm2, %v850_v18, %v846_v25 }
 0x1c1   : > { %v638_v7 = vpop.permute.xlu1 %637  ;;  %v635_v56 = vpop.permute.xlu0 %634 }
 0x1c2   : > { %v859_v31 = vrot.slane %v635_v56, %v3461_v29  ;;  %v864_v11 = vrot.slane %v638_v7, %v3468_v48 }
 0x1c4   : > { %v860_v53 = vsel %vm665_vm0, %v859_v31, %v855_v13 }
 0x1c5   : > { %v644_v6 = vpop.permute.xlu1 %643  ;;  %v641_v9 = vpop.permute.xlu0 %640  ;;  %v865_v16 = vsel %vm672_vm1, %v864_v11, %v860_v53 }
 0x1c6   : > { %v869_v0 = vrot.slane %v641_v9, %v3472_v38  ;;  %v874_v15 = vrot.slane %v644_v6, %v3464_v33 }
 0x1c8   : > { %v870_v23 = vsel %vm679_vm2, %v869_v0, %v865_v16 }
 0x1c9   : > { %v650_v57 = vpop.permute.xlu1 %649  ;;  %v647_v5 = vpop.permute.xlu0 %646  ;;  %v898_v32 = vsel %vm890_vm3, %v870_v23, %v851_v30 }
 0x1ca   : > { %v878_v17 = vrot.slane %v647_v5, %v3461_v29  ;;  %v883_v21 = vrot.slane %v650_v57, %v3468_v48 }
 0x1cc   : > { %v879_v22 = vsel %vm665_vm0, %v878_v17, %v874_v15 }
 0x1cd   : > { %v653_v61 = vpop.permute.xlu0 %652  ;;  %v884_v29 = vsel %vm672_vm1, %v883_v21, %v879_v22  ;;  %v3586_v35 = vpop.permute.xlu1 %923 }
 0x1ce   : > { %v888_v26 = vrot.slane %v653_v61, %v3472_v38 }
 0x1d0   : > { %v889_v1 = vsel %vm679_vm2, %v888_v26, %v884_v29 }
 0x1d1   : > { %v899_v48 = vsel %vm892_vm4, %v889_v1, %v898_v32  ;;  %v3588_v36 = vpop.permute.xlu1 %955  ;;  %v3612_v49 = vpop.permute.xlu0 %948 }
 0x1d2   : > { %v914_v34 = vsel %vm904_vm5, %v899_v48, 0.0 }
 0x1d3   : > { %915 = vadd.xlane.f32.xlu0 %v914_v34 }
 0x1d5   : > { %v3590_v37 = vpop.permute.xlu1 %962  ;;  %v3616_v52 = vpop.permute.xlu0 %976 }
 0x1d9   : > { %v3592_v38 = vpop.permute.xlu1 %969  ;;  %v3620_v55 = vpop.permute.xlu0 %990 }
 0x1dd   : > { %v3594_v39 = vpop.permute.xlu1 %983  ;;  %v3624_v59 = vpop.permute.xlu0 %1004 }
 0x1e1   : > { %v3596_v40 = vpop.permute.xlu1 %997  ;;  %v3628_v63 = vpop.permute.xlu0 %1018 }
 0x1e5   : > { %v3598_v41 = vpop.permute.xlu1 %1011  ;;  %v3632_v10 = vpop.permute.xlu0 %1032 }
 0x1e9   : > { %v3600_v42 = vpop.permute.xlu1 %1025  ;;  %v3637_v19 = vpop.permute.xlu0 %1046 }
 0x1ed   : > { %v3602_v43 = vpop.permute.xlu1 %1039  ;;  %v3647_v7 = vpop.permute.xlu0 %1060 }
 0x1f1   : > { %v3604_v44 = vpop.permute.xlu1 %1053  ;;  %v3653_v6 = vpop.permute.xlu0 %1074 }
 0x1f5   : > { %v3606_v45 = vpop.permute.xlu1 %1067  ;;  %v3663_v24 = vpop.permute.xlu0 %1088 }
 0x1f9   : > { %v3608_v46 = vpop.permute.xlu1 %1081  ;;  %v3669_v57 = vpop.permute.xlu0 %1102 }
 0x1fd   : > { %v3610_v47 = vpop.permute.xlu1 %1095  ;;  %v3679_v60 = vpop.permute.xlu0 %1116 }
 0x201   : > { %v3614_v51 = vpop.permute.xlu1 %1109  ;;  %v3685_v16 = vpop.permute.xlu0 %1130 }
 0x205   : > { %v3618_v54 = vpop.permute.xlu1 %1123  ;;  %v3695_v26 = vpop.permute.xlu0 %1144 }
 0x209   : > { %v3622_v58 = vpop.permute.xlu1 %1137  ;;  %v3701_v1 = vpop.permute.xlu0 %1158 }
 0x20d   : > { %v3626_v62 = vpop.permute.xlu1 %1151 }
 0x211   : > { %v3630_v3 = vpop.permute.xlu1 %1165 }
 0x243   : > { %v907_v2 = vpop.xlane.xlu1 %906 }
 0x244   : > { %v926_v14 = vadd.f32 %v3586_v35, %v907_v2 }
 0x246   : > { %v3635_v4 = vmax.f32 %v926_v14, 0.0  ;;  %v910_v14 = vpop.xlane.xlu0 %909 }
 0x248   : > { %v1200_v20 = vmul.f32 %v3588_v36, %v3635_v4  ;;  %v1199_v50 = vmul.f32 %v3612_v49, %v3635_v4  ;;  %v1202_v27 = vmul.f32 %v3592_v38, %v3635_v4  ;;  %v1201_v28 = vmul.f32 %v3590_v37, %v3635_v4 }
 0x249   : > { %v1204_v56 = vmul.f32 %v3594_v39, %v3635_v4  ;;  %v1203_v31 = vmul.f32 %v3616_v52, %v3635_v4  ;;  %v1206_v9 = vmul.f32 %v3596_v40, %v3635_v4  ;;  %v1205_v12 = vmul.f32 %v3620_v55, %v3635_v4 }
 0x24a   : > { %1459 = vperm.xlu1 %2943, %v1200_v20   ;;  %1456 = vperm.xlu0 %2942, %v1199_v50   ;;  %v1208_v13 = vmul.f32 %v3598_v41, %v3635_v4  ;;  %v1207_v11 = vmul.f32 %v3624_v59, %v3635_v4  ;;  %v1210_v53 = vmul.f32 %v3600_v42, %v3635_v4 }
 0x24b   : > { %v1209_v0 = vmul.f32 %v3628_v63, %v3635_v4  ;;  %v1212_v5 = vmul.f32 %v3602_v43, %v3635_v4  ;;  %v1211_v8 = vmul.f32 %v3632_v10, %v3635_v4  ;;  %v1214_v15 = vmul.f32 %v3604_v44, %v3635_v4 }
 0x24c   : > { %v1213_v17 = vmul.f32 %v3637_v19, %v3635_v4  ;;  %v1216_v18 = vmul.f32 %v3606_v45, %v3635_v4  ;;  %v1215_v21 = vmul.f32 %v3647_v7, %v3635_v4  ;;  %v1218_v22 = vmul.f32 %v3608_v46, %v3635_v4 }
 0x24d   : > { %v1217_v23 = vmul.f32 %v3653_v6, %v3635_v4  ;;  %v1220_v61 = vmul.f32 %v3610_v47, %v3635_v4  ;;  %v1219_v25 = vmul.f32 %v3663_v24, %v3635_v4  ;;  %v1222_v30 = vmul.f32 %v3614_v51, %v3635_v4 }
 0x24e   : > { %1465 = vperm.xlu1 %2943, %v1202_v27   ;;  %1462 = vperm.xlu0 %2942, %v1201_v28   ;;  %v1221_v29 = vmul.f32 %v3669_v57, %v3635_v4  ;;  %v1224_v32 = vmul.f32 %v3618_v54, %v3635_v4  ;;  %v1223_v48 = vmul.f32 %v3679_v60, %v3635_v4 }
 0x24f   : > { %v1226_v34 = vmul.f32 %v3622_v58, %v3635_v4  ;;  %v1225_v2 = vmul.f32 %v3685_v16, %v3635_v4  ;;  %v927_v20 = vadd.f32 %v3586_v35, %v910_v14  ;;  %v1228_v50 = vmul.f32 %v3626_v62, %v3635_v4 }
 0x250   : > { %v1227_v27 = vmul.f32 %v3695_v26, %v3635_v4 }
 0x251   : > { %v3716_v28 = vmax.f32 %v927_v20, 0.0 }
 0x252   : > { %1471 = vperm.xlu1 %2943, %v1204_v56   ;;  %1468 = vperm.xlu0 %2942, %v1203_v31   ;;  %v1230_v56 = vmul.f32 %v3630_v3, %v3635_v4  ;;  %v1229_v31 = vmul.f32 %v3701_v1, %v3635_v4 }
 0x253   : > { %v1236_v4 = vmul.f32 %v3594_v39, %v3716_v28  ;;  %v1253_v14 = vmul.f32 %v3669_v57, %v3716_v28  ;;  %v1256_v20 = vmul.f32 %v3618_v54, %v3716_v28 }
 0x256   : > { %1477 = vperm.xlu1 %2943, %v1206_v9   ;;  %1474 = vperm.xlu0 %2942, %v1205_v12   ;;  %v1232_v9 = vmul.f32 %v3588_v36, %v3716_v28  ;;  %v1231_v12 = vmul.f32 %v3612_v49, %v3716_v28 }
 0x25a   : > { %1483 = vperm.xlu1 %2943, %v1208_v13   ;;  %1480 = vperm.xlu0 %2942, %v1207_v11   ;;  %v1234_v13 = vmul.f32 %v3592_v38, %v3716_v28  ;;  %v1233_v11 = vmul.f32 %v3590_v37, %v3716_v28 }
 0x25e   : > { %1489 = vperm.xlu1 %2943, %v1210_v53   ;;  %1486 = vperm.xlu0 %2942, %v1209_v0   ;;  %v1235_v53 = vmul.f32 %v3616_v52, %v3716_v28  ;;  %v1238_v0 = vmul.f32 %v3596_v40, %v3716_v28 }
 0x262   : > { %1495 = vperm.xlu1 %2943, %v1212_v5   ;;  %1492 = vperm.xlu0 %2942, %v1211_v8   ;;  %v1237_v5 = vmul.f32 %v3620_v55, %v3716_v28  ;;  %v1240_v8 = vmul.f32 %v3598_v41, %v3716_v28 }
 0x266   : > { %1501 = vperm.xlu1 %2943, %v1214_v15   ;;  %1498 = vperm.xlu0 %2942, %v1213_v17   ;;  %v1239_v15 = vmul.f32 %v3624_v59, %v3716_v28  ;;  %v1242_v17 = vmul.f32 %v3600_v42, %v3716_v28 }
 0x26a   : > { %1507 = vperm.xlu1 %2943, %v1216_v18   ;;  %1504 = vperm.xlu0 %2942, %v1215_v21   ;;  %v1241_v18 = vmul.f32 %v3628_v63, %v3716_v28  ;;  %v1244_v21 = vmul.f32 %v3602_v43, %v3716_v28 }
 0x26e   : > { %1513 = vperm.xlu1 %2943, %v1218_v22   ;;  %1510 = vperm.xlu0 %2942, %v1217_v23   ;;  %v1243_v22 = vmul.f32 %v3632_v10, %v3716_v28  ;;  %v1246_v23 = vmul.f32 %v3604_v44, %v3716_v28 }
 0x272   : > { %1519 = vperm.xlu1 %2943, %v1220_v61   ;;  %1516 = vperm.xlu0 %2942, %v1219_v25   ;;  %v1245_v61 = vmul.f32 %v3637_v19, %v3716_v28  ;;  %v1248_v25 = vmul.f32 %v3606_v45, %v3716_v28 }
 0x276   : > { %1525 = vperm.xlu1 %2943, %v1222_v30   ;;  %1522 = vperm.xlu0 %2942, %v1221_v29   ;;  %v1247_v30 = vmul.f32 %v3647_v7, %v3716_v28  ;;  %v1250_v29 = vmul.f32 %v3608_v46, %v3716_v28 }
 0x27a   : > { %1531 = vperm.xlu1 %2943, %v1224_v32   ;;  %1528 = vperm.xlu0 %2942, %v1223_v48   ;;  %v1249_v32 = vmul.f32 %v3653_v6, %v3716_v28  ;;  %v1252_v48 = vmul.f32 %v3610_v47, %v3716_v28 }
 0x27e   : > { %1537 = vperm.xlu1 %2943, %v1226_v34   ;;  %1534 = vperm.xlu0 %2942, %v1225_v2   ;;  %v1251_v34 = vmul.f32 %v3663_v24, %v3716_v28  ;;  %v1254_v2 = vmul.f32 %v3614_v51, %v3716_v28 }
 0x282   : > { %1543 = vperm.xlu1 %2943, %v1228_v50   ;;  %1540 = vperm.xlu0 %2942, %v1227_v27   ;;  %v1255_v50 = vmul.f32 %v3679_v60, %v3716_v28  ;;  %v1258_v27 = vmul.f32 %v3622_v58, %v3716_v28 }
 0x286   : > { %1549 = vperm.xlu1 %2943, %v1230_v56   ;;  %1546 = vperm.xlu0 %2942, %v1229_v31   ;;  %v1257_v56 = vmul.f32 %v3685_v16, %v3716_v28  ;;  %v913_v31 = vpop.xlane.xlu0 %912 }
 0x28a   : > { %1555 = vperm.xlu1 %2943, %v1232_v9   ;;  %1552 = vperm.xlu0 %2942, %v1231_v12   ;;  %v928_v9 = vadd.f32 %v3586_v35, %v913_v31  ;;  %v1260_v12 = vmul.f32 %v3626_v62, %v3716_v28 }
 0x28e   : > { %1561 = vperm.xlu1 %2943, %v1234_v13   ;;  %1558 = vperm.xlu0 %2942, %v1233_v11   ;;  %v1259_v13 = vmul.f32 %v3695_v26, %v3716_v28  ;;  %v3783_v11 = vmax.f32 %v928_v9, 0.0 }
 0x292   : > { %1567 = vperm.xlu1 %2943, %v1236_v4   ;;  %1564 = vperm.xlu0 %2942, %v1235_v53   ;;  %v1262_v4 = vmul.f32 %v3630_v3, %v3716_v28  ;;  %v1261_v53 = vmul.f32 %v3701_v1, %v3716_v28  ;;  %v1265_v28 = vmul.f32 %v3590_v37, %v3783_v11 }
 0x296   : > { %1573 = vperm.xlu1 %2943, %v1238_v0   ;;  %1570 = vperm.xlu0 %2942, %v1237_v5   ;;  %v3789_v0 = vpop.xlane.xlu0 %915  ;;  %v1264_v5 = vmul.f32 %v3588_v36, %v3783_v11 }
 0x29a   : > { %1579 = vperm.xlu1 %2943, %v1240_v8   ;;  %1576 = vperm.xlu0 %2942, %v1239_v15   ;;  %v1263_v8 = vmul.f32 %v3612_v49, %v3783_v11 }
 0x29e   : > { %1585 = vperm.xlu1 %2943, %v1242_v17   ;;  %1582 = vperm.xlu0 %2942, %v1241_v18   ;;  %v1266_v18 = vmul.f32 %v3592_v38, %v3783_v11 }
 0x2a2   : > { %1591 = vperm.xlu1 %2943, %v1244_v21   ;;  %1588 = vperm.xlu0 %2942, %v1243_v22  }
 0x2a6   : > { %1597 = vperm.xlu1 %2943, %v1246_v23   ;;  %1594 = vperm.xlu0 %2942, %v1245_v61   ;;  %v1268_v23 = vmul.f32 %v3594_v39, %v3783_v11  ;;  %v1267_v61 = vmul.f32 %v3616_v52, %v3783_v11 }
 0x2aa   : > { %1603 = vperm.xlu1 %2943, %v1248_v25   ;;  %1600 = vperm.xlu0 %2942, %v1247_v30  }
 0x2ae   : > { %1609 = vperm.xlu1 %2943, %v1250_v29   ;;  %1606 = vperm.xlu0 %2942, %v1249_v32   ;;  %v1270_v29 = vmul.f32 %v3596_v40, %v3783_v11  ;;  %v1269_v32 = vmul.f32 %v3620_v55, %v3783_v11 }
 0x2b2   : > { %1615 = vperm.xlu1 %2943, %v1252_v48   ;;  %1612 = vperm.xlu0 %2942, %v1251_v34  }
 0x2b6   : > { %1621 = vperm.xlu1 %2943, %v1254_v2   ;;  %1618 = vperm.xlu0 %2942, %v1253_v14   ;;  %v1272_v2 = vmul.f32 %v3598_v41, %v3783_v11  ;;  %v1271_v14 = vmul.f32 %v3624_v59, %v3783_v11 }
 0x2ba   : > { %1627 = vperm.xlu1 %2943, %v1256_v20   ;;  %1624 = vperm.xlu0 %2942, %v1255_v50  }
 0x2be   : > { %1633 = vperm.xlu1 %2943, %v1258_v27   ;;  %1630 = vperm.xlu0 %2942, %v1257_v56   ;;  %v1274_v27 = vmul.f32 %v3600_v42, %v3783_v11  ;;  %v1273_v56 = vmul.f32 %v3628_v63, %v3783_v11 }
 0x2c2   : > { %1639 = vperm.xlu1 %2943, %v1260_v12   ;;  %1636 = vperm.xlu0 %2942, %v1259_v13   ;;  %v1276_v12 = vmul.f32 %v3602_v43, %v3783_v11  ;;  %v1275_v13 = vmul.f32 %v3632_v10, %v3783_v11 }
 0x2c6   : > { %1645 = vperm.xlu1 %2943, %v1262_v4   ;;  %1642 = vperm.xlu0 %2942, %v1261_v53  }
 0x2c9   : > { %v3795_v15 = vpop.permute.xlu1 %1459  ;;  %v3797_v17 = vpop.permute.xlu0 %1456 }
 0x2ca   : > { %1651 = vperm.xlu1 %2943, %v1264_v5   ;;  %1648 = vperm.xlu0 %2942, %v1263_v8   ;;  %v1278_v5 = vmul.f32 %v3604_v44, %v3783_v11  ;;  %v1277_v8 = vmul.f32 %v3637_v19, %v3783_v11 }
 0x2cd   : > { %v3803_v21 = vpop.permute.xlu1 %1465  ;;  %v3805_v22 = vpop.permute.xlu0 %1462 }
 0x2ce   : > { %1657 = vperm.xlu1 %2943, %v1266_v18   ;;  %1654 = vperm.xlu0 %2942, %v1265_v28  }
 0x2d1   : > { %v3811_v25 = vpop.permute.xlu1 %1471  ;;  %v3813_v30 = vpop.permute.xlu0 %1468 }
 0x2d2   : > { %1663 = vperm.xlu1 %2943, %v1268_v23   ;;  %1660 = vperm.xlu0 %2942, %v1267_v61   ;;  %v1280_v23 = vmul.f32 %v3606_v45, %v3783_v11  ;;  %v1279_v61 = vmul.f32 %v3647_v7, %v3783_v11 }
 0x2d5   : > { %v3819_v48 = vpop.permute.xlu1 %1477  ;;  %v3821_v34 = vpop.permute.xlu0 %1474 }
 0x2d6   : > { %4544 = vst [vmem:[#allocation8_spill] sm:$0xff] %v3819_v48  ;;  %4545 = vst [vmem:[#allocation9_spill] sm:$0xff] %v3821_v34  ;;  %1669 = vperm.xlu1 %2943, %v1270_v29   ;;  %1666 = vperm.xlu0 %2942, %v1269_v32  }
 0x2d9   : > { %v3827_v20 = vpop.permute.xlu1 %1483  ;;  %v3829_v50 = vpop.permute.xlu0 %1480 }
 0x2da   : > { %1675 = vperm.xlu1 %2943, %v1272_v2   ;;  %1672 = vperm.xlu0 %2942, %v1271_v14   ;;  %v1282_v2 = vmul.f32 %v3608_v46, %v3783_v11  ;;  %v1281_v14 = vmul.f32 %v3653_v6, %v3783_v11 }
 0x2dd   : > { %v3835_v31 = vpop.permute.xlu1 %1489  ;;  %v3837_v9 = vpop.permute.xlu0 %1486 }
 0x2de   : > { %1681 = vperm.xlu1 %2943, %v1274_v27   ;;  %1678 = vperm.xlu0 %2942, %v1273_v56  }
 0x2e1   : > { %v3843_v4 = vpop.permute.xlu1 %1495  ;;  %v3845_v53 = vpop.permute.xlu0 %1492 }
 0x2e2   : > { %4546 = vst [vmem:[#allocation10_spill] sm:$0xff] %v3843_v4  ;;  %1687 = vperm.xlu1 %2943, %v1276_v12   ;;  %1684 = vperm.xlu0 %2942, %v1275_v13   ;;  %v1284_v12 = vmul.f32 %v3610_v47, %v3783_v11  ;;  %v1283_v13 = vmul.f32 %v3663_v24, %v3783_v11 }
 0x2e3   : > { %v1292_v4 = vmul.f32 %v3626_v62, %v3783_v11 }
 0x2e5   : > { %v3851_v18 = vpop.permute.xlu1 %1501  ;;  %v3853_v28 = vpop.permute.xlu0 %1498 }
 0x2e6   : > { %4547 = vst [vmem:[#allocation11_spill] sm:$0xff] %v3851_v18  ;;  %4548 = vst [vmem:[#allocation12_spill] sm:$0xff] %v3853_v28  ;;  %1693 = vperm.xlu1 %2943, %v1278_v5   ;;  %1690 = vperm.xlu0 %2942, %v1277_v8   ;;  %v1288_v18 = vmul.f32 %v3618_v54, %v3783_v11  ;;  %v1290_v28 = vmul.f32 %v3622_v58, %v3783_v11 }
 0x2e9   : > { %v3859_v29 = vpop.permute.xlu1 %1507  ;;  %v3861_v32 = vpop.permute.xlu0 %1504 }
 0x2ea   : > { %1699 = vperm.xlu1 %2943, %v1280_v23   ;;  %1696 = vperm.xlu0 %2942, %v1279_v61   ;;  %v1286_v23 = vmul.f32 %v3614_v51, %v3783_v11  ;;  %v1285_v61 = vmul.f32 %v3669_v57, %v3783_v11 }
 0x2ed   : > { %v3867_v27 = vpop.permute.xlu1 %1513  ;;  %v3869_v56 = vpop.permute.xlu0 %1510 }
 0x2ee   : > { %1705 = vperm.xlu1 %2943, %v1282_v2   ;;  %1702 = vperm.xlu0 %2942, %v1281_v14  }
 0x2f1   : > { %v3875_v5 = vpop.permute.xlu1 %1519  ;;  %v3877_v8 = vpop.permute.xlu0 %1516 }
 0x2f2   : > { %4549 = vst [vmem:[#allocation13_spill] sm:$0xff] %v3875_v5  ;;  %1711 = vperm.xlu1 %2943, %v1284_v12   ;;  %1708 = vperm.xlu0 %2942, %v1283_v13   ;;  %v1287_v5 = vmul.f32 %v3679_v60, %v3783_v11 }
 0x2f5   : > { %v3883_v2 = vpop.permute.xlu1 %1525  ;;  %v3885_v14 = vpop.permute.xlu0 %1522 }
 0x2f6   : > { %4550 = vst [vmem:[#allocation14_spill] sm:$0xff] %v3883_v2  ;;  %4551 = vst [vmem:[#allocation15_spill] sm:$0xff] %v3885_v14  ;;  %1717 = vperm.xlu1 %2943, %v1286_v23   ;;  %1714 = vperm.xlu0 %2942, %v1285_v61   ;;  %v1289_v2 = vmul.f32 %v3685_v16, %v3783_v11  ;;  %v929_v14 = vadd.f32 %v3586_v35, %v3789_v0 }
 0x2f7   : > { %v1293_v35 = vmul.f32 %v3701_v1, %v3783_v11 }
 0x2f8   : > { %v3913_v48 = vmax.f32 %v929_v14, 0.0 }
 0x2f9   : > { %v3891_v12 = vpop.permute.xlu1 %1531  ;;  %v3893_v13 = vpop.permute.xlu0 %1528 }
 0x2fa   : > { %1723 = vperm.xlu1 %2943, %v1288_v18   ;;  %1720 = vperm.xlu0 %2942, %v1287_v5   ;;  %v1291_v18 = vmul.f32 %v3695_v26, %v3783_v11 }
 0x2fd   : > { %v3899_v23 = vpop.permute.xlu1 %1537  ;;  %v3901_v61 = vpop.permute.xlu0 %1534 }
 0x2fe   : > { %1729 = vperm.xlu1 %2943, %v1290_v28   ;;  %1726 = vperm.xlu0 %2942, %v1289_v2   ;;  %v1294_v28 = vmul.f32 %v3630_v3, %v3783_v11  ;;  %v1298_v11 = vmul.f32 %v3592_v38, %v3913_v48  ;;  %v1301_v38 = vmul.f32 %v3620_v55, %v3913_v48 }
 0x2ff   : > { %v1311_v55 = vmul.f32 %v3647_v7, %v3913_v48  ;;  %v1305_v7 = vmul.f32 %v3628_v63, %v3913_v48  ;;  %v1322_v63 = vmul.f32 %v3622_v58, %v3913_v48  ;;  %v1323_v58 = vmul.f32 %v3695_v26, %v3913_v48 }
 0x300   : > { %v1309_v26 = vmul.f32 %v3637_v19, %v3913_v48  ;;  %v1846_v19 = vrot.slane %v3795_v15, %v3464_v33 }
 0x301   : > { %v3909_v5 = vpop.permute.xlu1 %1543  ;;  %v3911_v34 = vpop.permute.xlu0 %1540 }
 0x302   : > { %4552 = vst [vmem:[#allocation16_spill] sm:$0xff] %v3909_v5  ;;  %1735 = vperm.xlu1 %2943, %v1292_v4   ;;  %1732 = vperm.xlu0 %2942, %v1291_v18   ;;  %v1296_v5 = vmul.f32 %v3588_v36, %v3913_v48  ;;  %v1295_v4 = vmul.f32 %v3612_v49, %v3913_v48 }
 0x303   : > { %v1300_v36 = vmul.f32 %v3594_v39, %v3913_v48  ;;  %v1299_v49 = vmul.f32 %v3616_v52, %v3913_v48  ;;  %v1304_v39 = vmul.f32 %v3598_v41, %v3913_v48  ;;  %v1303_v52 = vmul.f32 %v3624_v59, %v3913_v48 }
 0x304   : > { %v1320_v41 = vmul.f32 %v3618_v54, %v3913_v48  ;;  %v1319_v59 = vmul.f32 %v3679_v60, %v3913_v48  ;;  %v1306_v54 = vmul.f32 %v3600_v42, %v3913_v48  ;;  %v1321_v60 = vmul.f32 %v3685_v16, %v3913_v48 }
 0x305   : > { %v3919_v0 = vpop.permute.xlu1 %1549  ;;  %v3921_v2 = vpop.permute.xlu0 %1546  ;;  %v1315_v42 = vmul.f32 %v3663_v24, %v3913_v48  ;;  %v1307_v16 = vmul.f32 %v3632_v10, %v3913_v48  ;;  %v1324_v10 = vmul.f32 %v3626_v62, %v3913_v48  ;;  %v1316_v24 = vmul.f32 %v3610_v47, %v3913_v48 }
 0x306   : > { %4553 = vst [vmem:[#allocation17_spill] sm:$0xff] %v3919_v0  ;;  %1741 = vperm.xlu1 %2943, %v1294_v28   ;;  %1738 = vperm.xlu0 %2942, %v1293_v35   ;;  %v1297_v0 = vmul.f32 %v3590_v37, %v3913_v48  ;;  %v1302_v37 = vmul.f32 %v3596_v40, %v3913_v48 }
 0x307   : > { %v1312_v40 = vmul.f32 %v3606_v45, %v3913_v48  ;;  %v1313_v45 = vmul.f32 %v3653_v6, %v3913_v48  ;;  %v1314_v6 = vmul.f32 %v3608_v46, %v3913_v48  ;;  %v1308_v46 = vmul.f32 %v3602_v43, %v3913_v48 }
 0x308   : > { %v1317_v43 = vmul.f32 %v3669_v57, %v3913_v48  ;;  %v1310_v47 = vmul.f32 %v3604_v44, %v3913_v48  ;;  %v1325_v62 = vmul.f32 %v3701_v1, %v3913_v48  ;;  %v1842_v57 = vrot.slane %v3797_v17, %v3464_v33 }
 0x309   : > { %v3927_v14 = vpop.permute.xlu1 %1555  ;;  %v3929_v18 = vpop.permute.xlu0 %1552  ;;  %v1326_v44 = vmul.f32 %v3630_v3, %v3913_v48  ;;  %v1318_v1 = vmul.f32 %v3614_v51, %v3913_v48  ;;  %v1854_v17 = vrot.slane %v3803_v21, %v3464_v33  ;;  %v1858_v3 = vrot.slane %v3813_v30, %v3464_v33 }
 0x30a   : > { %1747 = vperm.xlu1 %2943, %v1296_v5   ;;  %1744 = vperm.xlu0 %2942, %v1295_v4   ;;  %v2351_v15 = vsel %vm890_vm3, %v1846_v19, %v1842_v57  ;;  %v1878_v51 = vrot.slane %v3827_v20, %v3464_v33  ;;  %v1874_v48 = vrot.slane %v3829_v50, %v3464_v33 }
 0x30b   : > { %v1906_v21 = vrot.slane %v3861_v32, %v3464_v33  ;;  %v1914_v30 = vrot.slane %v3869_v56, %v3464_v33  ;;  %v1942_v20 = vrot.slane %v3891_v12, %v3464_v33  ;;  %v1938_v50 = vrot.slane %v3893_v13, %v3464_v33 }
 0x30c   : > { %v1946_v32 = vrot.slane %v3901_v61, %v3464_v33  ;;  %v1886_v56 = vrot.slane %v3835_v31, %v3464_v33  ;;  %v1890_v13 = vrot.slane %v3845_v53, %v3464_v33  ;;  %v1922_v31 = vrot.slane %v3877_v8, %v3464_v33  ;;  %v4557_v8 = vld [vmem:[#allocation10_spill] sm:$0xff] }
 0x30d   : > { %v3935_v28 = vpop.permute.xlu1 %1561  ;;  %v3937_v35 = vpop.permute.xlu0 %1558 }
 0x30e   : > { %1753 = vperm.xlu1 %2943, %v1298_v11   ;;  %1750 = vperm.xlu0 %2942, %v1297_v0  }
 0x311   : > { %v3943_v5 = vpop.permute.xlu1 %1567  ;;  %v3945_v4 = vpop.permute.xlu0 %1564 }
 0x312   : > { %1759 = vperm.xlu1 %2943, %v1300_v36   ;;  %1756 = vperm.xlu0 %2942, %v1299_v49  }
 0x315   : > { %v3951_v11 = vpop.permute.xlu1 %1573  ;;  %v3953_v0 = vpop.permute.xlu0 %1570 }
 0x316   : > { %1765 = vperm.xlu1 %2943, %v1302_v37   ;;  %1762 = vperm.xlu0 %2942, %v1301_v38  }
 0x319   : > { %v3959_v36 = vpop.permute.xlu1 %1579  ;;  %v3961_v49 = vpop.permute.xlu0 %1576 }
 0x31a   : > { %1771 = vperm.xlu1 %2943, %v1304_v39   ;;  %1768 = vperm.xlu0 %2942, %v1303_v52  }
 0x31d   : > { %v3967_v37 = vpop.permute.xlu1 %1585  ;;  %v3969_v38 = vpop.permute.xlu0 %1582 }
 0x31e   : > { %1795 = vperm.xlu1 %2943, %v1312_v40   ;;  %1792 = vperm.xlu0 %2942, %v1311_v55  }
 0x321   : > { %v3975_v39 = vpop.permute.xlu1 %1591  ;;  %v3977_v52 = vpop.permute.xlu0 %1588 }
 0x322   : > { %1819 = vperm.xlu1 %2943, %v1320_v41   ;;  %1816 = vperm.xlu0 %2942, %v1319_v59  }
 0x325   : > { %v3983_v40 = vpop.permute.xlu1 %1597  ;;  %v3985_v55 = vpop.permute.xlu0 %1594 }
 0x326   : > { %1798 = vperm.xlu1 %2943, %v1313_v45   ;;  %1774 = vperm.xlu0 %2942, %v1305_v7  }
 0x329   : > { %v3991_v41 = vpop.permute.xlu1 %1603  ;;  %v3993_v59 = vpop.permute.xlu0 %1600 }
 0x32a   : > { %1777 = vperm.xlu1 %2943, %v1306_v54   ;;  %1822 = vperm.xlu0 %2942, %v1321_v60  }
 0x32d   : > { %v3999_v45 = vpop.permute.xlu1 %1609  ;;  %v4001_v7 = vpop.permute.xlu0 %1606 }
 0x32e   : > { %1825 = vperm.xlu1 %2943, %v1322_v63   ;;  %1801 = vperm.xlu0 %2942, %v1314_v6  }
 0x331   : > { %v4007_v54 = vpop.permute.xlu1 %1615  ;;  %v4009_v60 = vpop.permute.xlu0 %1612 }
 0x332   : > { %1804 = vperm.xlu1 %2943, %v1315_v42   ;;  %1780 = vperm.xlu0 %2942, %v1307_v16  }
 0x335   : > { %v4015_v63 = vpop.permute.xlu1 %1621  ;;  %v4017_v6 = vpop.permute.xlu0 %1618 }
 0x336   : > { %4554 = vst [vmem:[#allocation18_spill] sm:$0xff] %v4015_v63  ;;  %1783 = vperm.xlu1 %2943, %v1308_v46   ;;  %1828 = vperm.xlu0 %2942, %v1323_v58  }
 0x339   : > { %v4023_v42 = vpop.permute.xlu1 %1627  ;;  %v4025_v16 = vpop.permute.xlu0 %1624 }
 0x33a   : > { %1831 = vperm.xlu1 %2943, %v1324_v10   ;;  %1807 = vperm.xlu0 %2942, %v1316_v24  }
 0x33d   : > { %v4031_v46 = vpop.permute.xlu1 %1633  ;;  %v4033_v58 = vpop.permute.xlu0 %1630 }
 0x33e   : > { %1810 = vperm.xlu1 %2943, %v1317_v43   ;;  %1786 = vperm.xlu0 %2942, %v1309_v26   ;;  %v1850_v43 = vrot.slane %v3805_v22, %v3464_v33 }
 0x340   : > { %v2352_v22 = vsel %vm892_vm4, %v1850_v43, %v2351_v15 }
 0x341   : > { %v4039_v10 = vpop.permute.xlu1 %1639  ;;  %v4041_v24 = vpop.permute.xlu0 %1636 }
 0x342   : > { %1789 = vperm.xlu1 %2943, %v1310_v47   ;;  %1834 = vperm.xlu0 %2942, %v1325_v62   ;;  %v1882_v47 = vrot.slane %v3837_v9, %v3464_v33  ;;  %v1910_v62 = vrot.slane %v3859_v29, %v3464_v33  ;;  %v1862_v9 = vrot.slane %v3811_v25, %v3464_v33 }
 0x343   : > { %v2354_v29 = vsel %vm2353_vm6, %v1854_v17, %v2352_v22  ;;  %v2377_v22 = vsel %vm890_vm3, %v1942_v20, %v1938_v50  ;;  %v4558_v50 = vld [vmem:[#allocation12_spill] sm:$0xff] }
 0x344   : > { %v2356_v43 = vsel %vm2355_vm7, %v1858_v3, %v2354_v29  ;;  %v2370_v25 = vsel %vm890_vm3, %v1910_v62, %v1906_v21  ;;  %v1950_v3 = vrot.slane %v3899_v23, %v3464_v33  ;;  %v2378_v53 = vsel %vm892_vm4, %v1946_v32, %v2377_v22  ;;  %v4556_v62 = vld [vmem:[#allocation9_spill] sm:$0xff]  ;;  %v4560_v22 = vld [vmem:[#allocation15_spill] sm:$0xff] }
 0x345   : > { %v4053_v26 = vpop.permute.xlu1 %1645  ;;  %v4055_v63 = vpop.permute.xlu0 %1642  ;;  %v2371_v17 = vsel %vm892_vm4, %v1914_v30, %v2370_v25  ;;  %v1866_v21 = vrot.slane %v4556_v62, %v3464_v33  ;;  %v1894_v30 = vrot.slane %v4557_v8, %v3464_v33  ;;  %v1898_v29 = vrot.slane %v4558_v50, %v3464_v33 }
 0x346   : > { %1837 = vperm.xlu1 %2943, %v1326_v44   ;;  %1813 = vperm.xlu0 %2942, %v1318_v1   ;;  %v2363_v44 = vsel %vm890_vm3, %v1878_v51, %v1874_v48  ;;  %v1918_v1 = vrot.slane %v3867_v27, %v3464_v33  ;;  %v1954_v51 = vrot.slane %v3911_v34, %v3464_v33  ;;  %v4555_v48 = vld [vmem:[#allocation8_spill] sm:$0xff]  ;;  %v4559_v34 = vld [vmem:[#allocation13_spill] sm:$0xff] }
 0x347   : > { %v2364_v12 = vsel %vm892_vm4, %v1882_v47, %v2363_v44  ;;  %v2358_v27 = vsel %vm2357_vm8, %v1862_v9, %v2356_v43  ;;  %v1870_v47 = vrot.slane %v4555_v48, %v3464_v33  ;;  %v1926_v9 = vrot.slane %v4559_v34, %v3464_v33 }
 0x348   : > { %v2365_v20 = vsel %vm2353_vm6, %v1886_v56, %v2364_v12  ;;  %v2372_v32 = vsel %vm2353_vm6, %v1918_v1, %v2371_v17  ;;  %v1930_v48 = vrot.slane %v4560_v22, %v3464_v33  ;;  %v4561_v56 = vld [vmem:[#allocation16_spill] sm:$0xff]  ;;  %v1962_v8 = vrot.slane %v3921_v2, %v3464_v33  ;;  %v4564_v22 = vld [vmem:[#allocation17_spill] sm:$0xff] }
 0x349   : > { %v4073_v19 = vpop.permute.xlu1 %1651  ;;  %v4075_v57 = vpop.permute.xlu0 %1648  ;;  %v2366_v23 = vsel %vm2355_vm7, %v1890_v13, %v2365_v20  ;;  %v2373_v25 = vsel %vm2355_vm7, %v1922_v31, %v2372_v32  ;;  %v1958_v12 = vrot.slane %v4561_v56, %v3464_v33  ;;  %v2379_v13 = vsel %vm2353_vm6, %v1950_v3, %v2378_v53 }
 0x34a   : > { %v2380_v62 = vsel %vm2355_vm7, %v1954_v51, %v2379_v13  ;;  %v1974_v1 = vrot.slane %v3927_v14, %v3464_v33  ;;  %v1970_v17 = vrot.slane %v3929_v18, %v3464_v33  ;;  %v1978_v31 = vrot.slane %v3937_v35, %v3464_v33  ;;  %v4562_v51 = vld [vmem:[#allocation11_spill] sm:$0xff] }
 0x34b   : > { %v2006_v20 = vrot.slane %v3959_v36, %v3464_v33  ;;  %v2002_v3 = vrot.slane %v3961_v49, %v3464_v33  ;;  %v2360_v53 = vsel %vm2359_vm9, %v1866_v21, %v2358_v27  ;;  %v1902_v2 = vrot.slane %v4562_v51, %v3464_v33  ;;  %v4563_v36 = vld [vmem:[#allocation14_spill] sm:$0xff] }
 0x34c   : > { %v2010_v14 = vrot.slane %v3969_v38, %v3464_v33  ;;  %v2374_v35 = vsel %vm2357_vm8, %v1926_v9, %v2373_v25  ;;  %v2367_v34 = vsel %vm2357_vm8, %v1894_v30, %v2366_v23  ;;  %v1934_v32 = vrot.slane %v4563_v36, %v3464_v33 }
 0x34d   : > { %v4098_v61 = vpop.permute.xlu1 %1657  ;;  %v4100_v15 = vpop.permute.xlu0 %1654  ;;  %v2375_v49 = vsel %vm2359_vm9, %v1930_v48, %v2374_v35  ;;  %v2368_v27 = vsel %vm2359_vm9, %v1898_v29, %v2367_v34  ;;  %v2381_v21 = vsel %vm2357_vm8, %v1958_v12, %v2380_v62  ;;  %v1966_v38 = vrot.slane %v4564_v22, %v3464_v33 }
 0x34e   : > { %v2384_v56 = vsel %vm890_vm3, %v1974_v1, %v1970_v17  ;;  %v1982_v13 = vrot.slane %v3935_v28, %v3464_v33  ;;  %v2382_v9 = vsel %vm2359_vm9, %v1962_v8, %v2381_v21  ;;  %v1986_v23 = vrot.slane %v3945_v4, %v3464_v33 }
 0x34f   : > { %v2385_v30 = vsel %vm892_vm4, %v1978_v31, %v2384_v56  ;;  %v2391_v25 = vsel %vm890_vm3, %v2006_v20, %v2002_v3  ;;  %v2014_v29 = vrot.slane %v3967_v37, %v3464_v33  ;;  %v2018_v12 = vrot.slane %v3977_v52, %v3464_v33 }
 0x350   : > { %v2392_v48 = vsel %vm892_vm4, %v2010_v14, %v2391_v25  ;;  %v2362_v28 = vsel %vm2361_vm10, %v1870_v47, %v2360_v53  ;;  %v2386_v8 = vsel %vm2353_vm6, %v1982_v13, %v2385_v30  ;;  %v2376_v17 = vsel %vm2361_vm10, %v1934_v32, %v2375_v49 }
 0x351   : > { %v4125_v43 = vpop.permute.xlu1 %1663  ;;  %v4127_v44 = vpop.permute.xlu0 %1660  ;;  %v2369_v4 = vsel %vm2361_vm10, %v1902_v2, %v2368_v27  ;;  %v2383_v31 = vsel %vm2361_vm10, %v1966_v38, %v2382_v9  ;;  %v1990_v37 = vrot.slane %v3943_v5, %v3464_v33  ;;  %v2387_v20 = vsel %vm2355_vm7, %v1986_v23, %v2386_v8 }
 0x352   : > { %v2022_v52 = vrot.slane %v3975_v39, %v3464_v33  ;;  %v2393_v3 = vsel %vm2353_vm6, %v2014_v29, %v2392_v48  ;;  %v2026_v53 = vrot.slane %v3985_v55, %v3464_v33  ;;  %v2070_v51 = vrot.slane %v4023_v42, %v3464_v33 }
 0x353   : > { %v2394_v47 = vsel %vm2355_vm7, %v2018_v12, %v2393_v3  ;;  %v2066_v2 = vrot.slane %v4025_v16, %v3464_v33  ;;  %v2074_v35 = vrot.slane %v4033_v58, %v3464_v33  ;;  %v2485_v39 = vsel %vm2484_vm11, %v2362_v28, 0.0 }
 0x354   : > { %v2491_v34 = vsel %vm2484_vm11, %v2376_v17, 0.0  ;;  %v2488_v36 = vsel %vm2484_vm11, %v2369_v4, 0.0  ;;  %v1994_v55 = vrot.slane %v3953_v0, %v3464_v33  ;;  %v2038_v42 = vrot.slane %v3991_v41, %v3464_v33 }
 0x355   : > { %v4153_v50 = vpop.permute.xlu1 %1669  ;;  %v4155_v18 = vpop.permute.xlu0 %1666  ;;  %v2034_v16 = vrot.slane %v3993_v59, %v3464_v33  ;;  %v4209_v32 = vsel %vm2484_vm11, %v2383_v31, 0.0  ;;  %v1998_v58 = vrot.slane %v3951_v11, %v3464_v33  ;;  %v2042_v49 = vrot.slane %v4001_v7, %v3464_v33 }
 0x356   : > { %v2395_v27 = vsel %vm2357_vm8, %v2022_v52, %v2394_v47  ;;  %v2388_v21 = vsel %vm2357_vm8, %v1990_v37, %v2387_v20  ;;  %v2030_v0 = vrot.slane %v3983_v40, %v3464_v33  ;;  %v2405_v41 = vsel %vm890_vm3, %v2070_v51, %v2066_v2 }
 0x357   : > { %v2078_v59 = vrot.slane %v4031_v46, %v3464_v33  ;;  %v2396_v11 = vsel %vm2359_vm9, %v2026_v53, %v2395_v27  ;;  %v2406_v56 = vsel %vm892_vm4, %v2074_v35, %v2405_v41  ;;  %v2082_v7 = vrot.slane %v4041_v24, %v3464_v33 }
 0x358   : > { %v2398_v40 = vsel %vm890_vm3, %v2038_v42, %v2034_v16  ;;  %v2046_v30 = vrot.slane %v3999_v45, %v3464_v33  ;;  %v2389_v23 = vsel %vm2359_vm9, %v1994_v55, %v2388_v21  ;;  %v2050_v29 = vrot.slane %v4009_v60, %v3464_v33 }
 0x359   : > { %v1676_v62 = vpop.permute.xlu1 %1675  ;;  %v1673_v1 = vpop.permute.xlu0 %1672  ;;  %v2399_v25 = vsel %vm892_vm4, %v2042_v49, %v2398_v40  ;;  %v2102_v24 = vrot.slane %v4073_v19, %v3464_v33  ;;  %v2098_v48 = vrot.slane %v4075_v57, %v3464_v33  ;;  %v2086_v12 = vrot.slane %v4039_v10, %v3464_v33 }
 0x35a   : > { %v2134_v13 = vrot.slane %v1676_v62, %v3464_v33  ;;  %v2130_v9 = vrot.slane %v1673_v1, %v3464_v33  ;;  %v2407_v45 = vsel %vm2353_vm6, %v2078_v59, %v2406_v56  ;;  %v2106_v62 = vrot.slane %v4100_v15, %v3464_v33 }
 0x35b   : > { %v2397_v60 = vsel %vm2361_vm10, %v2030_v0, %v2396_v11  ;;  %v2408_v8 = vsel %vm2355_vm7, %v2082_v7, %v2407_v45  ;;  %v2090_v19 = vrot.slane %v4055_v63, %v3464_v33  ;;  %v2054_v17 = vrot.slane %v4007_v54, %v3464_v33 }
 0x35c   : > { %v2419_v57 = vsel %vm890_vm3, %v2134_v13, %v2130_v9  ;;  %v2400_v15 = vsel %vm2353_vm6, %v2046_v30, %v2399_v25  ;;  %v2058_v20 = vrot.slane %v4017_v6, %v3464_v33  ;;  %v2412_v63 = vsel %vm890_vm3, %v2102_v24, %v2098_v48 }
 0x35d   : > { %v1682_v14 = vpop.permute.xlu1 %1681  ;;  %v1679_v5 = vpop.permute.xlu0 %1678  ;;  %v2401_v37 = vsel %vm2355_vm7, %v2050_v29, %v2400_v15  ;;  %v2110_v52 = vrot.slane %v4098_v61, %v3464_v33  ;;  %v2094_v3 = vrot.slane %v4053_v26, %v3464_v33  ;;  %v2413_v54 = vsel %vm892_vm4, %v2106_v62, %v2412_v63 }
 0x35e   : > { %v2138_v46 = vrot.slane %v1679_v5, %v3464_v33  ;;  %v2142_v10 = vrot.slane %v1682_v14, %v3464_v33  ;;  %v2114_v47 = vrot.slane %v4127_v44, %v3464_v33  ;;  %v2409_v2 = vsel %vm2357_vm8, %v2086_v12, %v2408_v8 }
 0x35f   : > { %v2390_v61 = vsel %vm2361_vm10, %v1998_v58, %v2389_v23  ;;  %v2410_v26 = vsel %vm2359_vm9, %v2090_v19, %v2409_v2  ;;  %v2414_v42 = vsel %vm2353_vm6, %v2110_v52, %v2413_v54  ;;  %v2500_v16 = vsel %vm2484_vm11, %v2397_v60, 0.0 }
 0x360   : > { %v2420_v4 = vsel %vm892_vm4, %v2138_v46, %v2419_v57  ;;  %v2118_v58 = vrot.slane %v4125_v43, %v3464_v33  ;;  %v2415_v49 = vsel %vm2355_vm7, %v2114_v47, %v2414_v42  ;;  %v2411_v0 = vsel %vm2361_vm10, %v2094_v3, %v2410_v26 }
 0x361   : > { %v4222_v22 = vpop.permute.xlu1 %1687  ;;  %v1685_v38 = vpop.permute.xlu0 %1684  ;;  %v2421_v14 = vsel %vm2353_vm6, %v2142_v10, %v2420_v4  ;;  %v2122_v59 = vrot.slane %v4155_v18, %v3464_v33  ;;  %v2497_v13 = vsel %vm2484_vm11, %v2390_v61, 0.0  ;;  %v2126_v18 = vrot.slane %v4153_v50, %v3464_v33 }
 0x362   : > { %v2146_v31 = vrot.slane %v1685_v38, %v3464_v33  ;;  %v2150_v6 = vrot.slane %v4222_v22, %v3464_v33  ;;  %v2506_v30 = vsel %vm2484_vm11, %v2411_v0, 0.0  ;;  %v2416_v23 = vsel %vm2357_vm8, %v2118_v58, %v2415_v49 }
 0x363   : > { %v2417_v24 = vsel %vm2359_vm9, %v2122_v59, %v2416_v23 }
 0x364   : > { %v2422_v5 = vsel %vm2355_vm7, %v2146_v31, %v2421_v14  ;;  %v2418_v60 = vsel %vm2361_vm10, %v2126_v18, %v2417_v24 }
 0x365   : > { %v4247_v1 = vpop.permute.xlu1 %1693  ;;  %2486 = vadd.xlane.f32.xlu0 %v2485_v39  ;;  %v1691_v28 = vpop.permute.xlu0 %1690  ;;  %v2423_v43 = vsel %vm2357_vm8, %v2150_v6, %v2422_v5  ;;  %v2509_v10 = vsel %vm2484_vm11, %v2418_v60, 0.0 }
 0x366   : > { %v2154_v35 = vrot.slane %v1691_v28, %v3464_v33  ;;  %v2158_v22 = vrot.slane %v4247_v1, %v3464_v33 }
 0x368   : > { %v2424_v56 = vsel %vm2359_vm9, %v2154_v35, %v2423_v43 }
 0x369   : > { %v1700_v53 = vpop.permute.xlu1 %1699  ;;  %2492 = vadd.xlane.f32.xlu0 %v2491_v34  ;;  %v1697_v51 = vpop.permute.xlu0 %1696  ;;  %v4565_v34 = vld [vmem:[#allocation18_spill] sm:$0xff]  ;;  %v2425_v29 = vsel %vm2361_vm10, %v2158_v22, %v2424_v56 }
 0x36a   : > { %2489 = vadd.xlane.f32.xlu1 %v2488_v36  ;;  %v2166_v44 = vrot.slane %v1700_v53, %v3464_v33  ;;  %v2162_v39 = vrot.slane %v1697_v51, %v3464_v33  ;;  %v2062_v55 = vrot.slane %v4565_v34, %v3464_v33  ;;  %v2402_v36 = vsel %vm2357_vm8, %v2054_v17, %v2401_v37 }
 0x36b   : > { %v2403_v41 = vsel %vm2359_vm9, %v2058_v20, %v2402_v36  ;;  %v2512_v28 = vsel %vm2484_vm11, %v2425_v29, 0.0 }
 0x36c   : > { %v2426_v11 = vsel %vm890_vm3, %v2166_v44, %v2162_v39  ;;  %v2404_v46 = vsel %vm2361_vm10, %v2062_v55, %v2403_v41 }
 0x36d   : > { %v1706_v27 = vpop.permute.xlu1 %1705  ;;  %2495 = vadd.xlane.f32.xlu0 %v4209_v32  ;;  %v1703_v21 = vpop.permute.xlu0 %1702  ;;  %v2503_v45 = vsel %vm2484_vm11, %v2404_v46, 0.0 }
 0x36e   : > { %v2170_v38 = vrot.slane %v1703_v21, %v3464_v33  ;;  %2501 = vadd.xlane.f32.xlu1 %v2500_v16  ;;  %v2174_v32 = vrot.slane %v1706_v27, %v3464_v33 }
 0x370   : > { %v2427_v7 = vsel %vm892_vm4, %v2170_v38, %v2426_v11 }
 0x371   : > { %v1712_v9 = vpop.permute.xlu1 %1711  ;;  %2498 = vadd.xlane.f32.xlu0 %v2497_v13  ;;  %v1709_v40 = vpop.permute.xlu0 %1708  ;;  %v2428_v50 = vsel %vm2353_vm6, %v2174_v32, %v2427_v7 }
 0x372   : > { %v2178_v25 = vrot.slane %v1709_v40, %v3464_v33  ;;  %2507 = vadd.xlane.f32.xlu1 %v2506_v30  ;;  %v2182_v48 = vrot.slane %v1712_v9, %v3464_v33 }
 0x374   : > { %v2429_v12 = vsel %vm2355_vm7, %v2178_v25, %v2428_v50 }
 0x375   : > { %v1718_v62 = vpop.permute.xlu1 %1717  ;;  %2504 = vadd.xlane.f32.xlu0 %v2503_v45  ;;  %v1715_v1 = vpop.permute.xlu0 %1714  ;;  %v2430_v57 = vsel %vm2357_vm8, %v2182_v48, %v2429_v12 }
 0x376   : > { %v2190_v8 = vrot.slane %v1718_v62, %v3464_v33  ;;  %v2186_v19 = vrot.slane %v1715_v1, %v3464_v33  ;;  %2513 = vadd.xlane.f32.xlu1 %v2512_v28 }
 0x378   : > { %v2431_v17 = vsel %vm2359_vm9, %v2186_v19, %v2430_v57 }
 0x379   : > { %v1724_v15 = vpop.permute.xlu1 %1723  ;;  %2510 = vadd.xlane.f32.xlu0 %v2509_v10  ;;  %v1721_v4 = vpop.permute.xlu0 %1720  ;;  %v2432_v31 = vsel %vm2361_vm10, %v2190_v8, %v2431_v17 }
 0x37a   : > { %v2198_v37 = vrot.slane %v1724_v15, %v3464_v33  ;;  %v2194_v20 = vrot.slane %v1721_v4, %v3464_v33  ;;  %v2515_v63 = vsel %vm2484_vm11, %v2432_v31, 0.0 }
 0x37c   : > { %v2433_v47 = vsel %vm890_vm3, %v2198_v37, %v2194_v20 }
 0x37d   : > { %v1730_v52 = vpop.permute.xlu1 %1729  ;;  %2516 = vadd.xlane.f32.xlu0 %v2515_v63  ;;  %v1727_v3 = vpop.permute.xlu0 %1726 }
 0x37e   : > { %v2202_v54 = vrot.slane %v1727_v3, %v3464_v33  ;;  %v2206_v53 = vrot.slane %v1730_v52, %v3464_v33 }
 0x380   : > { %v2434_v51 = vsel %vm892_vm4, %v2202_v54, %v2433_v47 }
 0x381   : > { %v1736_v2 = vpop.permute.xlu1 %1735  ;;  %v1733_v6 = vpop.permute.xlu0 %1732  ;;  %v2435_v26 = vsel %vm2353_vm6, %v2206_v53, %v2434_v51 }
 0x382   : > { %v2210_v14 = vrot.slane %v1733_v6, %v3464_v33  ;;  %v2214_v61 = vrot.slane %v1736_v2, %v3464_v33 }
 0x384   : > { %v2436_v5 = vsel %vm2355_vm7, %v2210_v14, %v2435_v26 }
 0x385   : > { %v1742_v35 = vpop.permute.xlu1 %1741  ;;  %v1739_v44 = vpop.permute.xlu0 %1738  ;;  %v2437_v55 = vsel %vm2357_vm8, %v2214_v61, %v2436_v5 }
 0x386   : > { %v2222_v39 = vrot.slane %v1742_v35, %v3464_v33  ;;  %v2218_v34 = vrot.slane %v1739_v44, %v3464_v33 }
 0x388   : > { %v2438_v42 = vsel %vm2359_vm9, %v2218_v34, %v2437_v55 }
 0x389   : > { %v1748_v16 = vpop.permute.xlu1 %1747  ;;  %v1745_v36 = vpop.permute.xlu0 %1744  ;;  %v2439_v58 = vsel %vm2361_vm10, %v2222_v39, %v2438_v42 }
 0x38a   : > { %v2518_v49 = vsel %vm2484_vm11, %v2439_v58, 0.0  ;;  %v2230_v27 = vrot.slane %v1748_v16, %v3464_v33  ;;  %v2226_v21 = vrot.slane %v1745_v36, %v3464_v33 }
 0x38b   : > { %2519 = vadd.xlane.f32.xlu1 %v2518_v49 }
 0x38c   : > { %v2440_v22 = vsel %vm890_vm3, %v2230_v27, %v2226_v21 }
 0x38d   : > { %v1754_v0 = vpop.permute.xlu1 %1753  ;;  %v1751_v41 = vpop.permute.xlu0 %1750 }
 0x38e   : > { %v2234_v59 = vrot.slane %v1751_v41, %v3464_v33  ;;  %v2238_v38 = vrot.slane %v1754_v0, %v3464_v33 }
 0x390   : > { %v2441_v43 = vsel %vm892_vm4, %v2234_v59, %v2440_v22 }
 0x391   : > { %v1760_v11 = vpop.permute.xlu1 %1759  ;;  %v1757_v32 = vpop.permute.xlu0 %1756  ;;  %v2442_v13 = vsel %vm2353_vm6, %v2238_v38, %v2441_v43 }
 0x392   : > { %v2242_v56 = vrot.slane %v1757_v32, %v3464_v33  ;;  %v2246_v7 = vrot.slane %v1760_v11, %v3464_v33 }
 0x394   : > { %v2443_v18 = vsel %vm2355_vm7, %v2242_v56, %v2442_v13 }
 0x395   : > { %v1766_v9 = vpop.permute.xlu1 %1765  ;;  %v1763_v40 = vpop.permute.xlu0 %1762  ;;  %v2444_v23 = vsel %vm2357_vm8, %v2246_v7, %v2443_v18 }
 0x396   : > { %v2254_v30 = vrot.slane %v1766_v9, %v3464_v33  ;;  %v2250_v46 = vrot.slane %v1763_v40, %v3464_v33 }
 0x398   : > { %v2445_v25 = vsel %vm2359_vm9, %v2250_v46, %v2444_v23 }
 0x399   : > { %v1772_v29 = vpop.permute.xlu1 %1771  ;;  %v1769_v24 = vpop.permute.xlu0 %1768  ;;  %v2446_v48 = vsel %vm2361_vm10, %v2254_v30, %v2445_v25 }
 0x39a   : > { %v2521_v50 = vsel %vm2484_vm11, %v2446_v48, 0.0  ;;  %v2262_v63 = vrot.slane %v1772_v29, %v3464_v33  ;;  %v2258_v52 = vrot.slane %v1769_v24, %v3464_v33 }
 0x39b   : > { %2522 = vadd.xlane.f32.xlu0 %v2521_v50 }
 0x39c   : > { %v2447_v5 = vsel %vm890_vm3, %v2262_v63, %v2258_v52 }
 0x39d   : > { %v1796_v12 = vpop.permute.xlu1 %1795  ;;  %v1793_v45 = vpop.permute.xlu0 %1792 }
 0x39e   : > { %v2294_v3 = vrot.slane %v1796_v12, %v3464_v33  ;;  %v2290_v54 = vrot.slane %v1793_v45, %v3464_v33 }
 0x3a0   : > { %v2454_v44 = vsel %vm890_vm3, %v2294_v3, %v2290_v54 }
 0x3a1   : > { %v1820_v62 = vpop.permute.xlu1 %1819  ;;  %v1817_v1 = vpop.permute.xlu0 %1816 }
 0x3a2   : > { %v2326_v53 = vrot.slane %v1820_v62, %v3464_v33  ;;  %v2322_v51 = vrot.slane %v1817_v1, %v3464_v33 }
 0x3a4   : > { %v2461_v42 = vsel %vm890_vm3, %v2326_v53, %v2322_v51 }
 0x3a5   : > { %v1799_v28 = vpop.permute.xlu1 %1798  ;;  %v1775_v60 = vpop.permute.xlu0 %1774 }
 0x3a6   : > { %v2266_v47 = vrot.slane %v1775_v60, %v3464_v33  ;;  %v2298_v6 = vrot.slane %v1799_v28, %v3464_v33 }
 0x3a8   : > { %v2448_v39 = vsel %vm892_vm4, %v2266_v47, %v2447_v5  ;;  %v2455_v49 = vsel %vm892_vm4, %v2298_v6, %v2454_v44 }
 0x3a9   : > { %v1778_v8 = vpop.permute.xlu1 %1777  ;;  %v1823_v19 = vpop.permute.xlu0 %1822 }
 0x3aa   : > { %v2270_v2 = vrot.slane %v1778_v8, %v3464_v33  ;;  %v2330_v34 = vrot.slane %v1823_v19, %v3464_v33  ;;  %v2880_v19 = vld [vmem:[%s4536_s4] ss:$0 sm:$0xff] }
 0x3ac   : > { %v2449_v16 = vsel %vm2353_vm6, %v2270_v2, %v2448_v39  ;;  %v2462_v32 = vsel %vm892_vm4, %v2330_v34, %v2461_v42 }
 0x3ad   : > { %v1826_v57 = vpop.permute.xlu1 %1825  ;;  %v1802_v10 = vpop.permute.xlu0 %1801 }
 0x3ae   : > { %v2334_v36 = vrot.slane %v1826_v57, %v3464_v33  ;;  %v2302_v58 = vrot.slane %v1802_v10, %v3464_v33 }
 0x3b0   : > { %v2463_v18 = vsel %vm2353_vm6, %v2334_v36, %v2462_v32  ;;  %v2456_v9 = vsel %vm2353_vm6, %v2302_v58, %v2455_v49 }
 0x3b1   : > { %v1805_v17 = vpop.permute.xlu1 %1804  ;;  %v1781_v15 = vpop.permute.xlu0 %1780 }
 0x3b2   : > { %v2274_v14 = vrot.slane %v1781_v15, %v3464_v33  ;;  %v2306_v27 = vrot.slane %v1805_v17, %v3464_v33 }
 0x3b4   : > { %v2450_v21 = vsel %vm2355_vm7, %v2274_v14, %v2449_v16  ;;  %v2457_v30 = vsel %vm2355_vm7, %v2306_v27, %v2456_v9 }
 0x3b5   : > { %v1784_v4 = vpop.permute.xlu1 %1783  ;;  %v1829_v31 = vpop.permute.xlu0 %1828 }
 0x3b6   : > { %v2278_v35 = vrot.slane %v1784_v4, %v3464_v33  ;;  %v2338_v0 = vrot.slane %v1829_v31, %v3464_v33 }
 0x3b8   : > { %v2451_v22 = vsel %vm2357_vm8, %v2278_v35, %v2450_v21  ;;  %v2464_v46 = vsel %vm2355_vm7, %v2338_v0, %v2463_v18 }
 0x3b9   : > { %v1832_v37 = vpop.permute.xlu1 %1831  ;;  %v1808_v20 = vpop.permute.xlu0 %1807 }
 0x3ba   : > { %v2342_v38 = vrot.slane %v1832_v37, %v3464_v33  ;;  %v2310_v43 = vrot.slane %v1808_v20, %v3464_v33 }
 0x3bc   : > { %v2465_v24 = vsel %vm2357_vm8, %v2342_v38, %v2464_v46  ;;  %v2458_v48 = vsel %vm2357_vm8, %v2310_v43, %v2457_v30 }
 0x3bd   : > { %v1811_v61 = vpop.permute.xlu1 %1810  ;;  %v1787_v26 = vpop.permute.xlu0 %1786 }
 0x3be   : > { %v2282_v55 = vrot.slane %v1787_v26, %v3464_v33  ;;  %v2314_v56 = vrot.slane %v1811_v61, %v3464_v33 }
 0x3c0   : > { %v2452_v13 = vsel %vm2359_vm9, %v2282_v55, %v2451_v22  ;;  %v2459_v62 = vsel %vm2359_vm9, %v2314_v56, %v2458_v48 }
 0x3c1   : > { %v1790_v41 = vpop.permute.xlu1 %1789  ;;  %v1835_v59 = vpop.permute.xlu0 %1834 }
 0x3c2   : > { %v2286_v11 = vrot.slane %v1790_v41, %v3464_v33  ;;  %v2346_v7 = vrot.slane %v1835_v59, %v3464_v33 }
 0x3c4   : > { %v2453_v40 = vsel %vm2361_vm10, %v2286_v11, %v2452_v13  ;;  %v2466_v45 = vsel %vm2359_vm9, %v2346_v7, %v2465_v24 }
 0x3c5   : > { %v1838_v23 = vpop.permute.xlu1 %1837  ;;  %v1814_v25 = vpop.permute.xlu0 %1813  ;;  %v2524_v29 = vsel %vm2484_vm11, %v2453_v40, 0.0 }
 0x3c6   : > { %v2350_v50 = vrot.slane %v1838_v23, %v3464_v33  ;;  %v2318_v12 = vrot.slane %v1814_v25, %v3464_v33  ;;  %2525 = vadd.xlane.f32.xlu1 %v2524_v29 }
 0x3c8   : > { %v2467_v1 = vsel %vm2361_vm10, %v2350_v50, %v2466_v45  ;;  %v2460_v28 = vsel %vm2361_vm10, %v2318_v12, %v2459_v62 }
 0x3c9   : > { %v2530_v60 = vsel %vm2484_vm11, %v2467_v1, 0.0  ;;  %v2527_v8 = vsel %vm2484_vm11, %v2460_v28, 0.0 }
 0x3ca   : > { %2531 = vadd.xlane.f32.xlu1 %v2530_v60  ;;  %2528 = vadd.xlane.f32.xlu0 %v2527_v8 }
 0x3db   : > { %2543 = vbcast.lane.b32.xlu1 %v2880_v19, 264 }
 0x3df   : > { %2547 = vbcast.lane.b32.xlu1 %v2880_v19, 272 }
 0x3e0   : > { %2539 = vbcast.lane.b32.xlu0 %v2880_v19, 256 }
 0x3e3   : > { %2551 = vbcast.lane.b32.xlu1 %v2880_v19, 280 }
 0x3f2   : > { %v2487_v33 = vpop.xlane.xlu0 %2486 }
 0x3f6   : > { %v2493_v57 = vpop.xlane.xlu0 %2492 }
 0x3f7   : > { %v2490_v17 = vpop.xlane.xlu1 %2489 }
 0x3fa   : > { %v2496_v10 = vpop.xlane.xlu0 %2495 }
 0x3fb   : > { %v2502_v4 = vpop.xlane.xlu1 %2501 }
 0x3fe   : > { %v2499_v15 = vpop.xlane.xlu0 %2498 }
 0x3ff   : > { %v2508_v37 = vpop.xlane.xlu1 %2507 }
 0x402   : > { %v2505_v31 = vpop.xlane.xlu0 %2504 }
 0x403   : > { %v2514_v63 = vpop.xlane.xlu1 %2513 }
 0x406   : > { %v2511_v20 = vpop.xlane.xlu0 %2510 }
 0x40a   : > { %v2517_v52 = vpop.xlane.xlu0 %2516 }
 0x418   : > { %v2520_v3 = vpop.xlane.xlu1 %2519 }
 0x428   : > { %v2523_v54 = vpop.xlane.xlu0 %2522 }
 0x453   : > { %v2526_v47 = vpop.xlane.xlu1 %2525 }
 0x457   : > { %v4407_v53 = vpop.xlane.xlu1 %2531  ;;  %v4409_v51 = vpop.xlane.xlu0 %2528 }
 0x45b   : > { %v2544_v2 = vpop.permute.xlu1 %2543  ;;  %v2540_v6 = vpop.permute.xlu0 %2539 }
 0x45c   : > { %v2558_v14 = vadd.f32 %v2544_v2, %v2490_v17  ;;  %v2557_v61 = vadd.f32 %v2540_v6, %v2487_v33  ;;  %v2562_v44 = vadd.f32 %v2544_v2, %v2502_v4  ;;  %v2561_v34 = vadd.f32 %v2540_v6, %v2499_v15 }
 0x45d   : > { %v2566_v11 = vadd.f32 %v2544_v2, %v2514_v63  ;;  %v2565_v7 = vadd.f32 %v2540_v6, %v2511_v20  ;;  %v2570_v28 = vadd.f32 %v2544_v2, %v2526_v47  ;;  %v2569_v60 = vadd.f32 %v2540_v6, %v2523_v54 }
 0x45e   : > { %v2574_v26 = vmul.f32 0.16666667, %v2558_v14  ;;  %v2573_v35 = vmul.f32 0.16666667, %v2557_v61  ;;  %v2578_v58 = vmul.f32 0.16666667, %v2562_v44 }
 0x45f   : > { %v2548_v5 = vpop.permute.xlu1 %2547  ;;  %v2577_v21 = vmul.f32 0.16666667, %v2561_v34  ;;  %v2582_v29 = vmul.f32 0.16666667, %v2566_v11  ;;  %v2581_v24 = vmul.f32 0.16666667, %v2565_v7 }
 0x460   : > { %v2590_v39 = vadd.f32 0.5, %v2574_v26  ;;  %v2589_v42 = vadd.f32 0.5, %v2573_v35  ;;  %v2559_v16 = vadd.f32 %v2548_v5, %v2493_v57  ;;  %v2563_v59 = vadd.f32 %v2548_v5, %v2505_v31  ;;  %v2945_v11 = vld [vmem:[%s3221_s28 + $0x18] sm:$0xff] }
 0x461   : > { %v2594_v56 = vadd.f32 0.5, %v2578_v58  ;;  %v2593_v13 = vadd.f32 0.5, %v2577_v21  ;;  %v2567_v48 = vadd.f32 %v2548_v5, %v2517_v52  ;;  %v2598_v8 = vadd.f32 0.5, %v2582_v29  ;;  %v2950_v29 = vld [vmem:[%s3221_s28 + $0x30] sm:$0xff] }
 0x462   : > { %v2575_v49 = vmul.f32 0.16666667, %v2559_v16  ;;  %v2606_v27 = vmax.f32 %v2590_v39, 0.0  ;;  %v2605_v41 = vmax.f32 %v2589_v42, 0.0  ;;  %v2579_v9 = vmul.f32 0.16666667, %v2563_v59 }
 0x463   : > { %v2552_v55 = vpop.permute.xlu1 %2551  ;;  %v2610_v12 = vmax.f32 %v2594_v56, 0.0  ;;  %v2609_v45 = vmax.f32 %v2593_v13, 0.0  ;;  %v2597_v19 = vadd.f32 0.5, %v2581_v24  ;;  %v2583_v33 = vmul.f32 0.16666667, %v2567_v48  ;;  %v2946_v56 = vld [vmem:[%s3221_s28] sm:$0xff] }
 0x464   : > { %v2560_v36 = vadd.f32 %v2552_v55, %v2496_v10  ;;  %v2591_v22 = vadd.f32 0.5, %v2575_v49  ;;  %v2564_v38 = vadd.f32 %v2552_v55, %v2508_v37  ;;  %v2622_v30 = vmin.f32 %v2606_v27, 1.0  ;;  %v2947_v13 = vld [vmem:[%s3221_s28 + $0x8] sm:$0xff]  ;;  %v2951_v48 = vld [vmem:[%s3221_s28 + $0x38] sm:$0xff] }
 0x465   : > { %v2621_v46 = vmin.f32 %v2605_v41, 1.0  ;;  %v2568_v50 = vadd.f32 %v2552_v55, %v2520_v3  ;;  %v2595_v62 = vadd.f32 0.5, %v2579_v9  ;;  %v2625_v15 = vmin.f32 %v2609_v45, 1.0 }
 0x466   : > { %v2576_v0 = vmul.f32 0.16666667, %v2560_v36  ;;  %v2607_v32 = vmax.f32 %v2591_v22, 0.0  ;;  %v2580_v40 = vmul.f32 0.16666667, %v2564_v38  ;;  %2644 = vperm.xlu1 %2943, %v2622_v30   ;;  %v2626_v4 = vmin.f32 %v2610_v12, 1.0 }
 0x467   : > { %2639 = vperm.xlu0 %2942, %v2621_v46   ;;  %v2584_v57 = vmul.f32 0.16666667, %v2568_v50  ;;  %v2611_v10 = vmax.f32 %v2595_v62, 0.0  ;;  %v2586_v31 = vmul.f32 0.16666667, %v2570_v28  ;;  %v2614_v20 = vmax.f32 %v2598_v8, 0.0 }
 0x468   : > { %v2592_v43 = vadd.f32 0.5, %v2576_v0  ;;  %v2623_v23 = vmin.f32 %v2607_v32, 1.0  ;;  %v2596_v1 = vadd.f32 0.5, %v2580_v40  ;;  %v2585_v37 = vmul.f32 0.16666667, %v2569_v60  ;;  %v2944_v38 = vld [vmem:[%s3221_s28 + $0x10] sm:$0xff] }
 0x469   : > { %v2613_v63 = vmax.f32 %v2597_v19, 0.0  ;;  %v2571_v52 = vadd.f32 %v2548_v5, %v4409_v51  ;;  %v2572_v3 = vadd.f32 %v2552_v55, %v4407_v53  ;;  %v2599_v54 = vadd.f32 0.5, %v2583_v33  ;;  %v2948_v30 = vld [vmem:[%s3221_s28 + $0x20] sm:$0xff]  ;;  %v2953_v28 = vld [vmem:[%s3221_s28 + $0x48] sm:$0xff]  ;;  %v2954_v8 = vld [vmem:[%s3221_s28 + $0x50] sm:$0xff] }
 0x46a   : > { %v2608_v18 = vmax.f32 %v2592_v43, 0.0  ;;  %v2612_v17 = vmax.f32 %v2596_v1, 0.0  ;;  %v2600_v47 = vadd.f32 0.5, %v2584_v57  ;;  %v2627_v2 = vmin.f32 %v2611_v10, 1.0  ;;  %v2952_v62 = vld [vmem:[%s3221_s28 + $0x40] sm:$0xff]  ;;  %v2955_v33 = vld [vmem:[%s3221_s28 + $0x58] sm:$0xff] }
 0x46b   : > { %2649 = vperm.xlu0 %2942, %v2623_v23   ;;  %v2602_v14 = vadd.f32 0.5, %v2586_v31  ;;  %v2601_v61 = vadd.f32 0.5, %v2585_v37  ;;  %v2587_v26 = vmul.f32 0.16666667, %v2571_v52  ;;  %v2588_v35 = vmul.f32 0.16666667, %v2572_v3 }
 0x46c   : > { %v2624_v25 = vmin.f32 %v2608_v18, 1.0  ;;  %v2628_v6 = vmin.f32 %v2612_v17, 1.0  ;;  %v2615_v44 = vmax.f32 %v2599_v54, 0.0  ;;  %v2616_v39 = vmax.f32 %v2600_v47, 0.0  ;;  %v2949_v23 = vld [vmem:[%s3221_s28 + $0x28] sm:$0xff]  ;;  %v2959_v52 = vld [vmem:[%s3221_s28 + $0x78] sm:$0xff] }
 0x46d   : > { %v2629_v34 = vmin.f32 %v2613_v63, 1.0  ;;  %v2630_v42 = vmin.f32 %v2614_v20, 1.0  ;;  %v2618_v16 = vmax.f32 %v2602_v14, 0.0  ;;  %v2617_v51 = vmax.f32 %v2601_v61, 0.0  ;;  %v2957_v31 = vld [vmem:[%s3221_s28 + $0x68] sm:$0xff]  ;;  %v2958_v20 = vld [vmem:[%s3221_s28 + $0x70] sm:$0xff] }
 0x46e   : > { %2654 = vperm.xlu1 %2943, %v2624_v25   ;;  %v2603_v5 = vadd.f32 0.5, %v2587_v26  ;;  %v2604_v53 = vadd.f32 0.5, %v2588_v35  ;;  %v2631_v55 = vmin.f32 %v2615_v44, 1.0  ;;  %v2632_v36 = vmin.f32 %v2616_v39, 1.0  ;;  %v2961_v14 = vld [vmem:[%s3221_s28 + $0x88] sm:$0xff]  ;;  %v2962_v26 = vld [vmem:[%s3221_s28 + $0x90] sm:$0xff] }
 0x46f   : > { %2659 = vperm.xlu0 %2942, %v2625_v15   ;;  %v2633_v27 = vmin.f32 %v2617_v51, 1.0  ;;  %v2634_v21 = vmin.f32 %v2618_v16, 1.0  ;;  %v2956_v15 = vld [vmem:[%s3221_s28 + $0x60] sm:$0xff]  ;;  %v2963_v44 = vld [vmem:[%s3221_s28 + $0x98] sm:$0xff] }
 0x470   : > { %v2619_v58 = vmax.f32 %v2603_v5, 0.0  ;;  %v2620_v49 = vmax.f32 %v2604_v53, 0.0  ;;  %v2964_v16 = vld [vmem:[%s3221_s28 + $0xa0] sm:$0xff]  ;;  %v2965_v5 = vld [vmem:[%s3221_s28 + $0xa8] sm:$0xff] }
 0x472   : > { %2664 = vperm.xlu1 %2943, %v2626_v4   ;;  %v2635_v0 = vmin.f32 %v2619_v58, 1.0  ;;  %v2636_v41 = vmin.f32 %v2620_v49, 1.0  ;;  %v2967_v58 = vld [vmem:[%s3221_s28 + $0xb8] sm:$0xff] }
 0x473   : > { %2669 = vperm.xlu0 %2942, %v2627_v2   ;;  %v2960_v2 = vld [vmem:[%s3221_s28 + $0x80] sm:$0xff] }
 0x476   : > { %2674 = vperm.xlu1 %2943, %v2628_v6  }
 0x477   : > { %2679 = vperm.xlu0 %2942, %v2629_v34  }
 0x47a   : > { %2684 = vperm.xlu1 %2943, %v2630_v42  }
 0x47b   : > { %2689 = vperm.xlu0 %2942, %v2631_v55   ;;  %v2966_v55 = vld [vmem:[%s3221_s28 + $0xb0] sm:$0xff] }
 0x47e   : > { %2694 = vperm.xlu1 %2943, %v2632_v36  }
 0x47f   : > { %2699 = vperm.xlu0 %2942, %v2633_v27  }
 0x482   : > { %2704 = vperm.xlu1 %2943, %v2634_v21  }
 0x483   : > { %2709 = vperm.xlu0 %2942, %v2635_v0   ;;  %v2968_v0 = vld [vmem:[%s3221_s28 + $0xc0] sm:$0xff] }
 0x486   : > { %2714 = vperm.xlu1 %2943, %v2636_v41  }
 0x4e5   : > { %v2645_v59 = vpop.permute.xlu1 %2644 }
 0x4e6   : > { %v2640_v22 = vpop.permute.xlu0 %2639  ;;  %v2719_v43 = vmul.f32 %v2944_v38, %v2645_v59  ;;  %v2720_v32 = vmul.f32 %v2945_v11, %v2645_v59  ;;  %v2969_v59 = vld [vmem:[%s3221_s28 + $0xc8] sm:$0xff]  ;;  %v2970_v38 = vld [vmem:[%s3221_s28 + $0xd0] sm:$0xff]  ;;  %v2971_v11 = vld [vmem:[%s3221_s28 + $0xd8] sm:$0xff] }
 0x4e7   : > { %v2717_v7 = vmul.f32 %v2946_v56, %v2640_v22  ;;  %v2718_v18 = vmul.f32 %v2947_v13, %v2640_v22  ;;  %v2972_v13 = vld [vmem:[%s3221_s28 + $0xe0] sm:$0xff] }
 0x4e8   : > { %2751 = vst [vmem:[%s4419_s12 + $0x10] sm:$0xff] %v2719_v43  ;;  %2752 = vst [vmem:[%s4419_s12 + $0x18] sm:$0xff] %v2720_v32 }
 0x4e9   : > { %2749 = vst [vmem:[%s4419_s12] sm:$0xff] %v2717_v7  ;;  %2750 = vst [vmem:[%s4419_s12 + $0x8] sm:$0xff] %v2718_v18 }
 0x4ea   : > { %v2650_v9 = vpop.permute.xlu0 %2649 }
 0x4eb   : > { %v2721_v46 = vmul.f32 %v2948_v30, %v2650_v9  ;;  %v2722_v25 = vmul.f32 %v2949_v23, %v2650_v9  ;;  %v2973_v9 = vld [vmem:[%s3221_s28 + $0xe8] sm:$0xff]  ;;  %v2974_v30 = vld [vmem:[%s3221_s28 + $0xf0] sm:$0xff]  ;;  %v2975_v23 = vld [vmem:[%s3221_s28 + $0xf8] sm:$0xff] }
 0x4ed   : > { %v2655_v40 = vpop.permute.xlu1 %2654  ;;  %2753 = vst [vmem:[%s4419_s12 + $0x20] sm:$0xff] %v2721_v46  ;;  %2754 = vst [vmem:[%s4419_s12 + $0x28] sm:$0xff] %v2722_v25 }
 0x4ee   : > { %v2723_v24 = vmul.f32 %v2950_v29, %v2655_v40  ;;  %v2724_v50 = vmul.f32 %v2951_v48, %v2655_v40  ;;  %v2660_v12 = vpop.permute.xlu0 %2659 }
 0x4ef   : > { %v2725_v1 = vmul.f32 %v2952_v62, %v2660_v12  ;;  %v2726_v60 = vmul.f32 %v2953_v28, %v2660_v12 }
 0x4f0   : > { %2755 = vst [vmem:[%s4419_s12 + $0x30] sm:$0xff] %v2723_v24  ;;  %2756 = vst [vmem:[%s4419_s12 + $0x38] sm:$0xff] %v2724_v50 }
 0x4f1   : > { %v2665_v45 = vpop.permute.xlu1 %2664  ;;  %2757 = vst [vmem:[%s4419_s12 + $0x40] sm:$0xff] %v2725_v1  ;;  %2758 = vst [vmem:[%s4419_s12 + $0x48] sm:$0xff] %v2726_v60 }
 0x4f2   : > { %v2727_v19 = vmul.f32 %v2954_v8, %v2665_v45  ;;  %v2728_v57 = vmul.f32 %v2955_v33, %v2665_v45  ;;  %v2670_v10 = vpop.permute.xlu0 %2669 }
 0x4f3   : > { %v2729_v4 = vmul.f32 %v2956_v15, %v2670_v10  ;;  %v2730_v37 = vmul.f32 %v2957_v31, %v2670_v10 }
 0x4f4   : > { %2759 = vst [vmem:[%s4419_s12 + $0x50] sm:$0xff] %v2727_v19  ;;  %2760 = vst [vmem:[%s4419_s12 + $0x58] sm:$0xff] %v2728_v57 }
 0x4f5   : > { %v2675_v17 = vpop.permute.xlu1 %2674  ;;  %2761 = vst [vmem:[%s4419_s12 + $0x60] sm:$0xff] %v2729_v4  ;;  %2762 = vst [vmem:[%s4419_s12 + $0x68] sm:$0xff] %v2730_v37 }
 0x4f6   : > { %v2731_v63 = vmul.f32 %v2958_v20, %v2675_v17  ;;  %v2732_v3 = vmul.f32 %v2959_v52, %v2675_v17  ;;  %v2680_v54 = vpop.permute.xlu0 %2679 }
 0x4f7   : > { %v2733_v6 = vmul.f32 %v2960_v2, %v2680_v54  ;;  %v2734_v61 = vmul.f32 %v2961_v14, %v2680_v54 }
 0x4f8   : > { %2763 = vst [vmem:[%s4419_s12 + $0x70] sm:$0xff] %v2731_v63  ;;  %2764 = vst [vmem:[%s4419_s12 + $0x78] sm:$0xff] %v2732_v3 }
 0x4f9   : > { %v2685_v47 = vpop.permute.xlu1 %2684  ;;  %2765 = vst [vmem:[%s4419_s12 + $0x80] sm:$0xff] %v2733_v6  ;;  %2766 = vst [vmem:[%s4419_s12 + $0x88] sm:$0xff] %v2734_v61 }
 0x4fa   : > { %v2735_v35 = vmul.f32 %v2962_v26, %v2685_v47  ;;  %v2736_v39 = vmul.f32 %v2963_v44, %v2685_v47  ;;  %v2690_v34 = vpop.permute.xlu0 %2689 }
 0x4fb   : > { %v2737_v51 = vmul.f32 %v2964_v16, %v2690_v34  ;;  %v2738_v53 = vmul.f32 %v2965_v5, %v2690_v34 }
 0x4fc   : > { %2767 = vst [vmem:[%s4419_s12 + $0x90] sm:$0xff] %v2735_v35  ;;  %2768 = vst [vmem:[%s4419_s12 + $0x98] sm:$0xff] %v2736_v39 }
 0x4fd   : > { %v2695_v42 = vpop.permute.xlu1 %2694  ;;  %2769 = vst [vmem:[%s4419_s12 + $0xa0] sm:$0xff] %v2737_v51  ;;  %2770 = vst [vmem:[%s4419_s12 + $0xa8] sm:$0xff] %v2738_v53 }
 0x4fe   : > { %v2739_v36 = vmul.f32 %v2966_v55, %v2695_v42  ;;  %v2740_v49 = vmul.f32 %v2967_v58, %v2695_v42  ;;  %v2700_v27 = vpop.permute.xlu0 %2699 }
 0x4ff   : > { %v2741_v41 = vmul.f32 %v2968_v0, %v2700_v27  ;;  %v2742_v22 = vmul.f32 %v2969_v59, %v2700_v27 }
 0x500   : > { %2771 = vst [vmem:[%s4419_s12 + $0xb0] sm:$0xff] %v2739_v36  ;;  %2772 = vst [vmem:[%s4419_s12 + $0xb8] sm:$0xff] %v2740_v49 }
 0x501   : > { %v2705_v21 = vpop.permute.xlu1 %2704  ;;  %2773 = vst [vmem:[%s4419_s12 + $0xc0] sm:$0xff] %v2741_v41  ;;  %2774 = vst [vmem:[%s4419_s12 + $0xc8] sm:$0xff] %v2742_v22 }
 0x502   : > { %v2743_v43 = vmul.f32 %v2970_v38, %v2705_v21  ;;  %v2744_v32 = vmul.f32 %v2971_v11, %v2705_v21  ;;  %v2710_v56 = vpop.permute.xlu0 %2709 }
 0x503   : > { %v2745_v18 = vmul.f32 %v2972_v13, %v2710_v56  ;;  %v2746_v40 = vmul.f32 %v2973_v9, %v2710_v56 }
 0x504   : > { %2775 = vst [vmem:[%s4419_s12 + $0xd0] sm:$0xff] %v2743_v43  ;;  %2776 = vst [vmem:[%s4419_s12 + $0xd8] sm:$0xff] %v2744_v32 }
 0x505   : > { %v2715_v7 = vpop.permute.xlu1 %2714  ;;  %2777 = vst [vmem:[%s4419_s12 + $0xe0] sm:$0xff] %v2745_v18  ;;  %2778 = vst [vmem:[%s4419_s12 + $0xe8] sm:$0xff] %v2746_v40 }
 0x506   : > { %v2747_v46 = vmul.f32 %v2974_v30, %v2715_v7  ;;  %v2748_v25 = vmul.f32 %v2975_v23, %v2715_v7 }
 0x508   : > { %2779 = vst [vmem:[%s4419_s12 + $0xf0] sm:$0xff] %v2747_v46  ;;  %2780 = vst [vmem:[%s4419_s12 + $0xf8] sm:$0xff] %v2748_v25 }
 0x509   : > { %3019 = shalt.err (!%p3016_p2)
}
 0x50a   : > { %s3020_s28 = scalar_lea.hbm %s4478_s8, 4096  ;;  %s3024_s26 = scalar_lea.hbm %s4537_s5, 8192 }
 0x50b   : > { %p3021_p4 = scmp.ne.s32.totalorder %s4478_s8, %s3020_s28  ;;  %p3025_p9 = scmp.lt.u32.totalorder %s4478_s8, %s4537_s5 }
 0x50c   : > { %p3026_p1 = scmp.lt.u32.totalorder %s3024_s26, %s3020_s28  ;;  %p3028_p6 = scmp.lt.u32.totalorder %s3020_s28, %s4478_s8 }
 0x50d   : > { %p3022_p5 = pnand %p3021_p4, %p4566_p11 }
 0x50e   : > { %p3027_p3 = por %p3026_p1, %p3025_p9 }
 0x50f   : > { %p3023_p7 = pneg %p3022_p5 }
 0x510   : > { %p3029_p12 = por %p3028_p6, %p3027_p3 }
 0x512   : > { %p3030_p13 = pnand %p3029_p12, %p3023_p7 }
 0x514   : > { %3033 = shalt.err (!%p3030_p13)
}
 0x515   : > { %s3079_s25 = smov 256   ;;  %s3080_s15 = smov 16  }
 0x516   : > { %2893 = dma.vmem_to_hbm [thread:$0]  (%p4566_p11), %s4480_s14, 4096, %s4478_s8, %s2782_s22, %s3079_s25, %s3079_s25, %s3080_s15  }
 0x517 PF: > { %s2811_s16 = sand.u32 1, %s3060_s18   ;;  %p4567_p8 = scmp.ne.s32.totalorder %s4542_s6, 0 }
 0x518   : > { %p4568_p10 = scmp.ge.s32.totalorder %s3072_s21, 2  ;;  %s2812_s7 = scalar_lea.sflag [#allocation4], %s2811_s16 }
 0x51a   : > { %p2900_p0 = pnand %p4568_p10, %p4567_p8 }
 0x51c   : > { %3055 = dma.done.wait (!%p2900_p0), %s2812_s7, 4096  }
 0x51d   : > { %3057 = vsyncadd (!%p2900_p0), %s2812_s7, 4294963200  ;;  %p18_p2 = scmp.ge.s32.totalorder %s3136_s24, 4   ;;  %s4569_s18 = smov %s3064_s19 }
 0x51e   : > { %s4570_s19 = smov %s3068_s20  ;;  %s4571_s20 = smov %s3148_s27 }
 0x51f   : > { %s4572_s21 = smov %s3136_s24  ;;  %20 = sbr.rel (!%p18_p2) target bundleno = 5 (0x5), region = 85 }
 0x526   :  { %2817 = vsyncpa [#allocation3], 1 }
 0x527   :  { %2819 = vsyncpa [#allocation3 + $0x1], 1 }
 0x528   :  { %2820 = vsyncpa [#allocation4], 1 }
 0x529   :  { %2822 = vsyncpa [#allocation4 + $0x1], 1 }

</bundles_post_ra>
